<compile_context>
chip_gen: v7x
topology: tpu7x:2x2x1
jax: 0.10.0
libtpu: 0.0.40
codegen_flags: <defaults>
</compile_context>

<pallas_src>
import functools

import jax
import jax.numpy as jnp
from jax import lax
from jax.experimental import pallas as pl
from jax.experimental.pallas import tpu as pltpu


def _round_up(x, m):
    return ((x + m - 1) // m) * m


# ------------------------------ fused kernel ------------------------------

def _bottleneck_kernel(x_ref, w1_ref, b1_ref, w2_ref, b2_ref, w3_ref, b3_ref,
                       o_ref, h1pad_ref, *, H, W, planes, pad):
    """Fused Bottleneck forward for one batch image.

    x_ref : (1, Cin, M)          input image, channels-major (== NCHW slice)
    w1_ref: (planes, Cin)        conv1 weight^T, bn1 scale folded in
    b1_ref: (planes, 1)          bn1 shift
    w2_ref: (9, planes, planes)  conv2 taps (kh*3+kw, ci, co), bn2 folded in
    b2_ref: (1, planes)          bn2 shift
    w3_ref: (planes, Cexp)       conv3 weight, bn3 scale folded in
    b3_ref: (Cexp, 1)            bn3 shift
    o_ref : (1, Cexp, M)         output, channels-major (lane-dense store)
    h1pad_ref: (pad + M + pad, planes) f32 VMEM scratch (zero-padded h1)
    """
    M = H * W
    x_cm = x_ref[0]                                             # (Cin, M)

    # ---- conv1 (1x1) + bn1 + relu --- channels-major, lane-dense (planes, M)
    h1_cm = jnp.dot(w1_ref[...], x_cm, preferred_element_type=jnp.float32)
    h1_cm = jnp.maximum(h1_cm + b1_ref[...], 0.0)
    # dropout1: p == 0.0 -> identity (nothing to emit)

    # ---- conv2 (3x3, padding=1, stride=1) + bn2 + relu -----------------------
    # Row-major copy of h1 into a zero-padded scratch so every one of the 9
    # taps is a static sublane-offset slice; horizontal taps additionally get
    # a per-column validity mask.  All 9 contributions accumulate in f32.
    h1_mc = h1_cm.T                                             # (M, planes)
    h1pad_ref[...] = jnp.zeros_like(h1pad_ref)
    h1pad_ref[pad:pad + M, :] = h1_mc

    col = lax.broadcasted_iota(jnp.int32, (M, 1), 0) % W
    ok_left = col >= 1                  # source column c-1 is in range
    ok_right = col <= W - 2             # source column c+1 is in range

    acc = jnp.zeros((M, planes), jnp.float32)
    k = 0
    for dh in (-1, 0, 1):
        for dw in (-1, 0, 1):
            s = dh * W + dw
            tap = h1pad_ref[pad + s:pad + s + M, :]             # (M, planes)
            if dw == -1:
                tap = jnp.where(ok_left, tap, 0.0)
            elif dw == 1:
                tap = jnp.where(ok_right, tap, 0.0)
            acc = acc + jnp.dot(tap, w2_ref[k],
                                preferred_element_type=jnp.float32)
            k += 1
    h2 = jnp.maximum(acc + b2_ref[...], 0.0)                    # (M, planes)
    # dropout2: p == 0.0 -> identity

    # ---- conv3 (1x1) + bn3 + residual add + relu (ff_add_relu.add_relu) -----
    o_mc = jnp.dot(h2, w3_ref[...], preferred_element_type=jnp.float32)
    o_cm = o_mc.T + b3_ref[...] + x_cm                          # (Cexp, M)
    o_ref[0] = jnp.maximum(o_cm, 0.0).astype(o_ref.dtype)


# ------------------------------ glue helpers ------------------------------

def _bn_fold(gamma, beta, mean, var, eps=1e-5):
    scale = gamma * lax.rsqrt(var + eps)
    shift = beta - mean * scale
    return scale.astype(jnp.float32), shift.astype(jnp.float32)


@functools.partial(jax.jit, static_argnames=("planes", "expansion", "stride"))
def bottleneck_forward(x_nchw, params, *, planes, expansion, stride=1):
    (w1, g1, b1, m1, v1,
     w2, g2, b2, m2, v2,
     w3, g3, b3, m3, v3) = params

    N, Cin, H, W = x_nchw.shape
    Cexp = planes * expansion
    M = H * W
    if stride != 1 or Cin != Cexp:
        # TODO(synk): downsample / residual_block / stride>1 residual paths.
        raise NotImplementedError(
            "identity-residual config only (stride=1, inplanes==planes*expansion)")

    s1, t1 = _bn_fold(g1, b1, m1, v1)
    s2, t2 = _bn_fold(g2, b2, m2, v2)
    s3, t3 = _bn_fold(g3, b3, m3, v3)

    # Fold the BN scales into the conv weights (inference-mode BN is affine).
    w1t = w1.astype(jnp.float32).T * s1[:, None]                 # (planes, Cin)
    w2f = (w2.astype(jnp.float32) * s2[None, None, None, :]).reshape(
        9, planes, planes)                                       # (9, ci, co)
    w3f = w3.astype(jnp.float32) * s3[None, :]                   # (planes, Cexp)
    b1c = t1[:, None]                                            # (planes, 1)
    b2c = t2[None, :]                                            # (1, planes)
    b3c = t3[:, None]                                            # (Cexp, 1)

    pad = _round_up(W + 1, 8)            # halo rows (>= W+1, sublane aligned)
    x_flat = x_nchw.reshape(N, Cin, M)   # free reshape, stays NCHW in HBM

    kernel = functools.partial(_bottleneck_kernel,
                               H=H, W=W, planes=planes, pad=pad)
    out = pl.pallas_call(
        kernel,
        out_shape=jax.ShapeDtypeStruct((N, Cexp, M), x_nchw.dtype),
        grid_spec=pltpu.PrefetchScalarGridSpec(
            num_scalar_prefetch=0,
            grid=(N,),
            in_specs=[
                pl.BlockSpec((1, Cin, M), lambda i: (i, 0, 0)),
                pl.BlockSpec((planes, Cin), lambda i: (0, 0)),
                pl.BlockSpec((planes, 1), lambda i: (0, 0)),
                pl.BlockSpec((9, planes, planes), lambda i: (0, 0, 0)),
                pl.BlockSpec((1, planes), lambda i: (0, 0)),
                pl.BlockSpec((planes, Cexp), lambda i: (0, 0)),
                pl.BlockSpec((Cexp, 1), lambda i: (0, 0)),
            ],
            out_specs=pl.BlockSpec((1, Cexp, M), lambda i: (i, 0, 0)),
            scratch_shapes=[pltpu.VMEM((pad + M + pad, planes), jnp.float32)],
        ),
        compiler_params=pltpu.CompilerParams(
            dimension_semantics=("parallel",)),
    )(x_flat, w1t, b1c, w2f, b2c, w3f, b3c)

    return out.reshape(N, Cexp, H, W)


# --------------------------- pure-JAX reference ---------------------------

def reference_forward(x_nchw, params, *, planes, expansion, stride=1):
    (w1, g1, b1, m1, v1,
     w2, g2, b2, m2, v2,
     w3, g3, b3, m3, v3) = params
    x = jnp.transpose(x_nchw, (0, 2, 3, 1))
    dn = ("NHWC", "HWIO", "NHWC")

    def bn(y, g, b, m, v):
        return (y - m) * lax.rsqrt(v + 1e-5) * g + b

    inplanes = x.shape[-1]
    h = lax.conv_general_dilated(x, w1.reshape(1, 1, inplanes, planes),
                                 (1, 1), "VALID", dimension_numbers=dn)
    h = jax.nn.relu(bn(h, g1, b1, m1, v1))
    h = lax.conv_general_dilated(h, w2, (stride, stride), ((1, 1), (1, 1)),
                                 dimension_numbers=dn)
    h = jax.nn.relu(bn(h, g2, b2, m2, v2))
    h = lax.conv_general_dilated(h, w3.reshape(1, 1, planes, planes * expansion),
                                 (1, 1), "VALID", dimension_numbers=dn)
    h = bn(h, g3, b3, m3, v3)
    out = jax.nn.relu(h + x)
    return jnp.transpose(out, (0, 3, 1, 2))


# ----------------------------------- main -----------------------------------

if __name__ == "__main__":
    # Identity-residual Bottleneck: inplanes == planes * expansion, stride = 1
    # (downsample=None, residual_block=None, dropout=0.0).
    N, H, W = 2, 16, 16
    planes, expansion, stride = 8, 4, 1
    inplanes = planes * expansion  # 32

    key = jax.random.PRNGKey(0)
    ks = jax.random.split(key, 16)

    def u(k, shape, lo, hi):
        return jax.random.uniform(k, shape, jnp.float32, lo, hi)

    # conv weights (bias=False). 1x1 convs stored as (Cin, Cout); the 3x3 conv
    # is stored HWIO (3, 3, Cin, Cout).
    w1 = jax.random.normal(ks[0], (inplanes, planes), jnp.float32) * 0.1
    w2 = jax.random.normal(ks[1], (3, 3, planes, planes), jnp.float32) * 0.1
    w3 = jax.random.normal(ks[2], (planes, planes * expansion), jnp.float32) * 0.1

    # BatchNorm (inference-mode running stats + affine params)
    g1, b1 = u(ks[3], (planes,), 0.5, 1.5), jax.random.normal(ks[4], (planes,)) * 0.1
    m1, v1 = jax.random.normal(ks[5], (planes,)) * 0.1, u(ks[6], (planes,), 0.5, 1.5)
    g2, b2 = u(ks[7], (planes,), 0.5, 1.5), jax.random.normal(ks[8], (planes,)) * 0.1
    m2, v2 = jax.random.normal(ks[9], (planes,)) * 0.1, u(ks[10], (planes,), 0.5, 1.5)
    cexp = planes * expansion
    g3, b3 = u(ks[11], (cexp,), 0.5, 1.5), jax.random.normal(ks[12], (cexp,)) * 0.1
    m3, v3 = jax.random.normal(ks[13], (cexp,)) * 0.1, u(ks[14], (cexp,), 0.5, 1.5)

    params = (w1, g1, b1, m1, v1,
              w2, g2, b2, m2, v2,
              w3, g3, b3, m3, v3)

    x = jax.random.normal(ks[15], (N, inplanes, H, W), jnp.float32)  # NCHW

    out = bottleneck_forward(x, params, planes=planes, expansion=expansion,
                             stride=stride)
    out = jax.block_until_ready(out)

    ref = reference_forward(x, params, planes=planes, expansion=expansion,
                            stride=stride)
    ref = jax.block_until_ready(ref)

    assert out.shape == (N, planes * expansion, H, W), out.shape
    assert jnp.allclose(out, ref, rtol=1e-4, atol=1e-4), (
        float(jnp.max(jnp.abs(out - ref))))

    print("KERNEL_OK")
</pallas_src>

<mosaic_0001>
module attributes {stable_mosaic.version = 11 : i64} {
  func.func @_bottleneck_kernel(%arg0: i32, %arg1: memref<1x32x256xf32, #tpu.memory_space<vmem>>, %arg2: memref<8x32xf32, #tpu.memory_space<vmem>>, %arg3: memref<8x1xf32, #tpu.memory_space<vmem>>, %arg4: memref<9x8x8xf32, #tpu.memory_space<vmem>>, %arg5: memref<1x8xf32, #tpu.memory_space<vmem>>, %arg6: memref<8x32xf32, #tpu.memory_space<vmem>>, %arg7: memref<32x1xf32, #tpu.memory_space<vmem>>, %arg8: memref<1x32x256xf32, #tpu.memory_space<vmem>>, %arg9: memref<304x8xf32, #tpu.memory_space<vmem>>) attributes {dimension_semantics = [#tpu.dimension_semantics<parallel>], iteration_bounds = array<i64: 2>, scalar_prefetch = 0 : i64, scratch_operands = 1 : i64, tpu.core_type = #tpu.core_type<tc>, window_params = [{transform_indices = @transform_0, window_bounds = array<i64: 1, 32, 256>}, {pipeline_mode = #tpu.pipeline_mode<synchronous>, transform_indices = @transform_1, window_bounds = array<i64: 8, 32>}, {pipeline_mode = #tpu.pipeline_mode<synchronous>, transform_indices = @transform_2, window_bounds = array<i64: 8, 1>}, {pipeline_mode = #tpu.pipeline_mode<synchronous>, transform_indices = @transform_3, window_bounds = array<i64: 9, 8, 8>}, {pipeline_mode = #tpu.pipeline_mode<synchronous>, transform_indices = @transform_4, window_bounds = array<i64: 1, 8>}, {pipeline_mode = #tpu.pipeline_mode<synchronous>, transform_indices = @transform_5, window_bounds = array<i64: 8, 32>}, {pipeline_mode = #tpu.pipeline_mode<synchronous>, transform_indices = @transform_6, window_bounds = array<i64: 32, 1>}, {transform_indices = @transform_7, window_bounds = array<i64: 1, 32, 256>}]} {
    %c0 = arith.constant 0 : index
    %c0_0 = arith.constant 0 : index
    %c0_1 = arith.constant 0 : index
    %0 = vector.load %arg1[%c0, %c0_0, %c0_1] : memref<1x32x256xf32, #tpu.memory_space<vmem>>, vector<1x32x256xf32>
    %1 = vector.shape_cast %0 : vector<1x32x256xf32> to vector<32x256xf32>
    %c0_2 = arith.constant 0 : index
    %c0_3 = arith.constant 0 : index
    %2 = vector.load %arg2[%c0_2, %c0_3] : memref<8x32xf32, #tpu.memory_space<vmem>>, vector<8x32xf32>
    %cst = arith.constant dense<0.000000e+00> : vector<8x256xf32>
    %3 = tpu.matmul %2, %1, %cst {dimension_numbers = #tpu.dot_dimension_numbers<[1], [0], [0], [1], [0, 0, 1, 1], [], []>} : vector<8x32xf32>, vector<32x256xf32>, vector<8x256xf32> -> vector<8x256xf32>
    %c0_4 = arith.constant 0 : index
    %c0_5 = arith.constant 0 : index
    %4 = vector.load %arg3[%c0_4, %c0_5] : memref<8x1xf32, #tpu.memory_space<vmem>>, vector<8x1xf32>
    %5 = vector.broadcast %4 : vector<8x1xf32> to vector<8x256xf32>
    %6 = arith.addf %3, %5 : vector<8x256xf32>
    %cst_6 = arith.constant 0.000000e+00 : f32
    %7 = vector.broadcast %cst_6 : f32 to vector<8x256xf32>
    %8 = arith.maximumf %6, %7 : vector<8x256xf32>
    %9 = tpu.transpose %8, [1, 0] : vector<8x256xf32> -> vector<256x8xf32>
    %cst_7 = arith.constant 0.000000e+00 : f32
    %10 = vector.broadcast %cst_7 : f32 to vector<304x8xf32>
    %c0_8 = arith.constant 0 : index
    %c0_9 = arith.constant 0 : index
    %11 = vector.load %arg9[%c0_8, %c0_9] : memref<304x8xf32, #tpu.memory_space<vmem>>, vector<304x8xf32>
    tpu.vector_store %arg9[%c0_8, %c0_9], %10 {strides = array<i32>} : memref<304x8xf32, #tpu.memory_space<vmem>>, vector<304x8xf32>,
    %c24 = arith.constant 24 : index
    %c0_10 = arith.constant 0 : index
    %12 = vector.load %arg9[%c24, %c0_10] : memref<304x8xf32, #tpu.memory_space<vmem>>, vector<256x8xf32>
    tpu.vector_store %arg9[%c24, %c0_10], %9 {strides = array<i32>} : memref<304x8xf32, #tpu.memory_space<vmem>>, vector<256x8xf32>,
    %13 = tpu.iota {dimensions = array<i32: 0>} : vector<256x1xi32>
    %c16_i32 = arith.constant 16 : i32
    %c0_i32 = arith.constant 0 : i32
    %14 = arith.cmpi eq, %c16_i32, %c0_i32 : i32
    %c1_i32 = arith.constant 1 : i32
    %15 = arith.select %14, %c1_i32, %c16_i32 : i32
    %16 = vector.broadcast %15 : i32 to vector<256x1xi32>
    %17 = arith.remsi %13, %16 : vector<256x1xi32>
    %c0_i32_11 = arith.constant 0 : i32
    %18 = vector.broadcast %c0_i32_11 : i32 to vector<256x1xi32>
    %19 = arith.cmpi ne, %17, %18 : vector<256x1xi32>
    %c0_i32_12 = arith.constant 0 : i32
    %20 = vector.broadcast %c0_i32_12 : i32 to vector<256x1xi32>
    %21 = arith.cmpi slt, %17, %20 : vector<256x1xi32>
    %c0_i32_13 = arith.constant 0 : i32
    %22 = arith.cmpi slt, %15, %c0_i32_13 : i32
    %23 = vector.broadcast %22 : i1 to vector<256x1xi1>
    %24 = vector.broadcast %23 : vector<256x1xi1> to vector<256x1xi1>
    %25 = arith.xori %21, %24 : vector<256x1xi1>
    %26 = arith.andi %25, %19 : vector<256x1xi1>
    %27 = vector.broadcast %15 : i32 to vector<256x1xi32>
    %28 = arith.addi %17, %27 : vector<256x1xi32>
    %29 = arith.select %26, %28, %17 : vector<256x1xi1>, vector<256x1xi32>
    %c1_i32_14 = arith.constant 1 : i32
    %30 = vector.broadcast %c1_i32_14 : i32 to vector<256x1xi32>
    %31 = arith.cmpi sge, %29, %30 : vector<256x1xi32>
    %c14_i32 = arith.constant 14 : i32
    %32 = vector.broadcast %c14_i32 : i32 to vector<256x1xi32>
    %33 = arith.cmpi sle, %29, %32 : vector<256x1xi32>
    %cst_15 = arith.constant 0.000000e+00 : f32
    %34 = vector.broadcast %cst_15 : f32 to vector<256x8xf32>
    %c7 = arith.constant 7 : index
    %c0_16 = arith.constant 0 : index
    %35 = vector.load %arg9[%c7, %c0_16] : memref<304x8xf32, #tpu.memory_space<vmem>>, vector<256x8xf32>
    %cst_17 = arith.constant 0.000000e+00 : f32
    %36 = vector.shape_cast %31 : vector<256x1xi1> to vector<256x1xi1>
    %37 = vector.broadcast %36 : vector<256x1xi1> to vector<256x8xi1>
    %38 = vector.broadcast %cst_17 : f32 to vector<256x8xf32>
    %39 = arith.select %37, %35, %38 : vector<256x8xi1>, vector<256x8xf32>
    %c0_18 = arith.constant 0 : index
    %c0_19 = arith.constant 0 : index
    %c0_20 = arith.constant 0 : index
    %40 = vector.load %arg4[%c0_18, %c0_19, %c0_20] : memref<9x8x8xf32, #tpu.memory_space<vmem>>, vector<1x8x8xf32>
    %41 = vector.shape_cast %40 : vector<1x8x8xf32> to vector<8x8xf32>
    %cst_21 = arith.constant dense<0.000000e+00> : vector<256x8xf32>
    %42 = tpu.matmul %39, %41, %cst_21 {dimension_numbers = #tpu.dot_dimension_numbers<[1], [0], [0], [1], [0, 0, 1, 1], [], []>} : vector<256x8xf32>, vector<8x8xf32>, vector<256x8xf32> -> vector<256x8xf32>
    %43 = arith.addf %34, %42 : vector<256x8xf32>
    %c8 = arith.constant 8 : index
    %c0_22 = arith.constant 0 : index
    %44 = vector.load %arg9[%c8, %c0_22] : memref<304x8xf32, #tpu.memory_space<vmem>>, vector<256x8xf32>
    %c1 = arith.constant 1 : index
    %c0_23 = arith.constant 0 : index
    %c0_24 = arith.constant 0 : index
    %45 = vector.load %arg4[%c1, %c0_23, %c0_24] : memref<9x8x8xf32, #tpu.memory_space<vmem>>, vector<1x8x8xf32>
    %46 = vector.shape_cast %45 : vector<1x8x8xf32> to vector<8x8xf32>
    %cst_25 = arith.constant dense<0.000000e+00> : vector<256x8xf32>
    %47 = tpu.matmul %44, %46, %cst_25 {dimension_numbers = #tpu.dot_dimension_numbers<[1], [0], [0], [1], [0, 0, 1, 1], [], []>} : vector<256x8xf32>, vector<8x8xf32>, vector<256x8xf32> -> vector<256x8xf32>
    %48 = arith.addf %43, %47 : vector<256x8xf32>
    %c9 = arith.constant 9 : index
    %c0_26 = arith.constant 0 : index
    %49 = vector.load %arg9[%c9, %c0_26] : memref<304x8xf32, #tpu.memory_space<vmem>>, vector<256x8xf32>
    %cst_27 = arith.constant 0.000000e+00 : f32
    %50 = vector.shape_cast %33 : vector<256x1xi1> to vector<256x1xi1>
    %51 = vector.broadcast %50 : vector<256x1xi1> to vector<256x8xi1>
    %52 = vector.broadcast %cst_27 : f32 to vector<256x8xf32>
    %53 = arith.select %51, %49, %52 : vector<256x8xi1>, vector<256x8xf32>
    %c2 = arith.constant 2 : index
    %c0_28 = arith.constant 0 : index
    %c0_29 = arith.constant 0 : index
    %54 = vector.load %arg4[%c2, %c0_28, %c0_29] : memref<9x8x8xf32, #tpu.memory_space<vmem>>, vector<1x8x8xf32>
    %55 = vector.shape_cast %54 : vector<1x8x8xf32> to vector<8x8xf32>
    %cst_30 = arith.constant dense<0.000000e+00> : vector<256x8xf32>
    %56 = tpu.matmul %53, %55, %cst_30 {dimension_numbers = #tpu.dot_dimension_numbers<[1], [0], [0], [1], [0, 0, 1, 1], [], []>} : vector<256x8xf32>, vector<8x8xf32>, vector<256x8xf32> -> vector<256x8xf32>
    %57 = arith.addf %48, %56 : vector<256x8xf32>
    %c23 = arith.constant 23 : index
    %c0_31 = arith.constant 0 : index
    %58 = vector.load %arg9[%c23, %c0_31] : memref<304x8xf32, #tpu.memory_space<vmem>>, vector<256x8xf32>
    %cst_32 = arith.constant 0.000000e+00 : f32
    %59 = vector.shape_cast %31 : vector<256x1xi1> to vector<256x1xi1>
    %60 = vector.broadcast %59 : vector<256x1xi1> to vector<256x8xi1>
    %61 = vector.broadcast %cst_32 : f32 to vector<256x8xf32>
    %62 = arith.select %60, %58, %61 : vector<256x8xi1>, vector<256x8xf32>
    %c3 = arith.constant 3 : index
    %c0_33 = arith.constant 0 : index
    %c0_34 = arith.constant 0 : index
    %63 = vector.load %arg4[%c3, %c0_33, %c0_34] : memref<9x8x8xf32, #tpu.memory_space<vmem>>, vector<1x8x8xf32>
    %64 = vector.shape_cast %63 : vector<1x8x8xf32> to vector<8x8xf32>
    %cst_35 = arith.constant dense<0.000000e+00> : vector<256x8xf32>
    %65 = tpu.matmul %62, %64, %cst_35 {dimension_numbers = #tpu.dot_dimension_numbers<[1], [0], [0], [1], [0, 0, 1, 1], [], []>} : vector<256x8xf32>, vector<8x8xf32>, vector<256x8xf32> -> vector<256x8xf32>
    %66 = arith.addf %57, %65 : vector<256x8xf32>
    %c24_36 = arith.constant 24 : index
    %c0_37 = arith.constant 0 : index
    %67 = vector.load %arg9[%c24_36, %c0_37] : memref<304x8xf32, #tpu.memory_space<vmem>>, vector<256x8xf32>
    %c4 = arith.constant 4 : index
    %c0_38 = arith.constant 0 : index
    %c0_39 = arith.constant 0 : index
    %68 = vector.load %arg4[%c4, %c0_38, %c0_39] : memref<9x8x8xf32, #tpu.memory_space<vmem>>, vector<1x8x8xf32>
    %69 = vector.shape_cast %68 : vector<1x8x8xf32> to vector<8x8xf32>
    %cst_40 = arith.constant dense<0.000000e+00> : vector<256x8xf32>
    %70 = tpu.matmul %67, %69, %cst_40 {dimension_numbers = #tpu.dot_dimension_numbers<[1], [0], [0], [1], [0, 0, 1, 1], [], []>} : vector<256x8xf32>, vector<8x8xf32>, vector<256x8xf32> -> vector<256x8xf32>
    %71 = arith.addf %66, %70 : vector<256x8xf32>
    %c25 = arith.constant 25 : index
    %c0_41 = arith.constant 0 : index
    %72 = vector.load %arg9[%c25, %c0_41] : memref<304x8xf32, #tpu.memory_space<vmem>>, vector<256x8xf32>
    %cst_42 = arith.constant 0.000000e+00 : f32
    %73 = vector.shape_cast %33 : vector<256x1xi1> to vector<256x1xi1>
    %74 = vector.broadcast %73 : vector<256x1xi1> to vector<256x8xi1>
    %75 = vector.broadcast %cst_42 : f32 to vector<256x8xf32>
    %76 = arith.select %74, %72, %75 : vector<256x8xi1>, vector<256x8xf32>
    %c5 = arith.constant 5 : index
    %c0_43 = arith.constant 0 : index
    %c0_44 = arith.constant 0 : index
    %77 = vector.load %arg4[%c5, %c0_43, %c0_44] : memref<9x8x8xf32, #tpu.memory_space<vmem>>, vector<1x8x8xf32>
    %78 = vector.shape_cast %77 : vector<1x8x8xf32> to vector<8x8xf32>
    %cst_45 = arith.constant dense<0.000000e+00> : vector<256x8xf32>
    %79 = tpu.matmul %76, %78, %cst_45 {dimension_numbers = #tpu.dot_dimension_numbers<[1], [0], [0], [1], [0, 0, 1, 1], [], []>} : vector<256x8xf32>, vector<8x8xf32>, vector<256x8xf32> -> vector<256x8xf32>
    %80 = arith.addf %71, %79 : vector<256x8xf32>
    %c39 = arith.constant 39 : index
    %c0_46 = arith.constant 0 : index
    %81 = vector.load %arg9[%c39, %c0_46] : memref<304x8xf32, #tpu.memory_space<vmem>>, vector<256x8xf32>
    %cst_47 = arith.constant 0.000000e+00 : f32
    %82 = vector.shape_cast %31 : vector<256x1xi1> to vector<256x1xi1>
    %83 = vector.broadcast %82 : vector<256x1xi1> to vector<256x8xi1>
    %84 = vector.broadcast %cst_47 : f32 to vector<256x8xf32>
    %85 = arith.select %83, %81, %84 : vector<256x8xi1>, vector<256x8xf32>
    %c6 = arith.constant 6 : index
    %c0_48 = arith.constant 0 : index
    %c0_49 = arith.constant 0 : index
    %86 = vector.load %arg4[%c6, %c0_48, %c0_49] : memref<9x8x8xf32, #tpu.memory_space<vmem>>, vector<1x8x8xf32>
    %87 = vector.shape_cast %86 : vector<1x8x8xf32> to vector<8x8xf32>
    %cst_50 = arith.constant dense<0.000000e+00> : vector<256x8xf32>
    %88 = tpu.matmul %85, %87, %cst_50 {dimension_numbers = #tpu.dot_dimension_numbers<[1], [0], [0], [1], [0, 0, 1, 1], [], []>} : vector<256x8xf32>, vector<8x8xf32>, vector<256x8xf32> -> vector<256x8xf32>
    %89 = arith.addf %80, %88 : vector<256x8xf32>
    %c40 = arith.constant 40 : index
    %c0_51 = arith.constant 0 : index
    %90 = vector.load %arg9[%c40, %c0_51] : memref<304x8xf32, #tpu.memory_space<vmem>>, vector<256x8xf32>
    %c7_52 = arith.constant 7 : index
    %c0_53 = arith.constant 0 : index
    %c0_54 = arith.constant 0 : index
    %91 = vector.load %arg4[%c7_52, %c0_53, %c0_54] : memref<9x8x8xf32, #tpu.memory_space<vmem>>, vector<1x8x8xf32>
    %92 = vector.shape_cast %91 : vector<1x8x8xf32> to vector<8x8xf32>
    %cst_55 = arith.constant dense<0.000000e+00> : vector<256x8xf32>
    %93 = tpu.matmul %90, %92, %cst_55 {dimension_numbers = #tpu.dot_dimension_numbers<[1], [0], [0], [1], [0, 0, 1, 1], [], []>} : vector<256x8xf32>, vector<8x8xf32>, vector<256x8xf32> -> vector<256x8xf32>
    %94 = arith.addf %89, %93 : vector<256x8xf32>
    %c41 = arith.constant 41 : index
    %c0_56 = arith.constant 0 : index
    %95 = vector.load %arg9[%c41, %c0_56] : memref<304x8xf32, #tpu.memory_space<vmem>>, vector<256x8xf32>
    %cst_57 = arith.constant 0.000000e+00 : f32
    %96 = vector.shape_cast %33 : vector<256x1xi1> to vector<256x1xi1>
    %97 = vector.broadcast %96 : vector<256x1xi1> to vector<256x8xi1>
    %98 = vector.broadcast %cst_57 : f32 to vector<256x8xf32>
    %99 = arith.select %97, %95, %98 : vector<256x8xi1>, vector<256x8xf32>
    %c8_58 = arith.constant 8 : index
    %c0_59 = arith.constant 0 : index
    %c0_60 = arith.constant 0 : index
    %100 = vector.load %arg4[%c8_58, %c0_59, %c0_60] : memref<9x8x8xf32, #tpu.memory_space<vmem>>, vector<1x8x8xf32>
    %101 = vector.shape_cast %100 : vector<1x8x8xf32> to vector<8x8xf32>
    %cst_61 = arith.constant dense<0.000000e+00> : vector<256x8xf32>
    %102 = tpu.matmul %99, %101, %cst_61 {dimension_numbers = #tpu.dot_dimension_numbers<[1], [0], [0], [1], [0, 0, 1, 1], [], []>} : vector<256x8xf32>, vector<8x8xf32>, vector<256x8xf32> -> vector<256x8xf32>
    %103 = arith.addf %94, %102 : vector<256x8xf32>
    %c0_62 = arith.constant 0 : index
    %c0_63 = arith.constant 0 : index
    %104 = vector.load %arg5[%c0_62, %c0_63] : memref<1x8xf32, #tpu.memory_space<vmem>>, vector<1x8xf32>
    %105 = vector.broadcast %104 : vector<1x8xf32> to vector<256x8xf32>
    %106 = arith.addf %103, %105 : vector<256x8xf32>
    %cst_64 = arith.constant 0.000000e+00 : f32
    %107 = vector.broadcast %cst_64 : f32 to vector<256x8xf32>
    %108 = arith.maximumf %106, %107 : vector<256x8xf32>
    %c0_65 = arith.constant 0 : index
    %c0_66 = arith.constant 0 : index
    %109 = vector.load %arg6[%c0_65, %c0_66] : memref<8x32xf32, #tpu.memory_space<vmem>>, vector<8x32xf32>
    %cst_67 = arith.constant dense<0.000000e+00> : vector<256x32xf32>
    %110 = tpu.matmul %108, %109, %cst_67 {dimension_numbers = #tpu.dot_dimension_numbers<[1], [0], [0], [1], [0, 0, 1, 1], [], []>} : vector<256x8xf32>, vector<8x32xf32>, vector<256x32xf32> -> vector<256x32xf32>
    %111 = tpu.transpose %110, [1, 0] : vector<256x32xf32> -> vector<32x256xf32>
    %c0_68 = arith.constant 0 : index
    %c0_69 = arith.constant 0 : index
    %112 = vector.load %arg7[%c0_68, %c0_69] : memref<32x1xf32, #tpu.memory_space<vmem>>, vector<32x1xf32>
    %113 = vector.broadcast %112 : vector<32x1xf32> to vector<32x256xf32>
    %114 = arith.addf %111, %113 : vector<32x256xf32>
    %115 = arith.addf %114, %1 : vector<32x256xf32>
    %cst_70 = arith.constant 0.000000e+00 : f32
    %116 = vector.broadcast %cst_70 : f32 to vector<32x256xf32>
    %117 = arith.maximumf %115, %116 : vector<32x256xf32>
    %c0_71 = arith.constant 0 : index
    %c0_72 = arith.constant 0 : index
    %c0_73 = arith.constant 0 : index
    %118 = vector.load %arg8[%c0_71, %c0_72, %c0_73] : memref<1x32x256xf32, #tpu.memory_space<vmem>>, vector<1x32x256xf32>
    %119 = vector.shape_cast %118 : vector<1x32x256xf32> to vector<32x256xf32>
    %120 = vector.shape_cast %117 : vector<32x256xf32> to vector<1x32x256xf32>
    tpu.vector_store %arg8[%c0_71, %c0_72, %c0_73], %120 {strides = array<i32>} : memref<1x32x256xf32, #tpu.memory_space<vmem>>, vector<1x32x256xf32>,
    return
  }
  func.func @transform_0(%arg0: i32) -> (i32, i32, i32) {
    %c0_i32 = arith.constant 0 : i32
    %c0_i32_0 = arith.constant 0 : i32
    %c0_i32_1 = arith.constant 0 : i32
    return %arg0, %c0_i32, %c0_i32_0 : i32, i32, i32
  }
  func.func @transform_1(%arg0: i32) -> (i32, i32) {
    %c0_i32 = arith.constant 0 : i32
    %c0_i32_0 = arith.constant 0 : i32
    %c0_i32_1 = arith.constant 0 : i32
    return %c0_i32, %c0_i32_0 : i32, i32
  }
  func.func @transform_2(%arg0: i32) -> (i32, i32) {
    %c0_i32 = arith.constant 0 : i32
    %c0_i32_0 = arith.constant 0 : i32
    %c0_i32_1 = arith.constant 0 : i32
    return %c0_i32, %c0_i32_0 : i32, i32
  }
  func.func @transform_3(%arg0: i32) -> (i32, i32, i32) {
    %c0_i32 = arith.constant 0 : i32
    %c0_i32_0 = arith.constant 0 : i32
    %c0_i32_1 = arith.constant 0 : i32
    %c0_i32_2 = arith.constant 0 : i32
    return %c0_i32, %c0_i32_0, %c0_i32_1 : i32, i32, i32
  }
  func.func @transform_4(%arg0: i32) -> (i32, i32) {
    %c0_i32 = arith.constant 0 : i32
    %c0_i32_0 = arith.constant 0 : i32
    %c0_i32_1 = arith.constant 0 : i32
    return %c0_i32, %c0_i32_0 : i32, i32
  }
  func.func @transform_5(%arg0: i32) -> (i32, i32) {
    %c0_i32 = arith.constant 0 : i32
    %c0_i32_0 = arith.constant 0 : i32
    %c0_i32_1 = arith.constant 0 : i32
    return %c0_i32, %c0_i32_0 : i32, i32
  }
  func.func @transform_6(%arg0: i32) -> (i32, i32) {
    %c0_i32 = arith.constant 0 : i32
    %c0_i32_0 = arith.constant 0 : i32
    %c0_i32_1 = arith.constant 0 : i32
    return %c0_i32, %c0_i32_0 : i32, i32
  }
  func.func @transform_7(%arg0: i32) -> (i32, i32, i32) {
    %c0_i32 = arith.constant 0 : i32
    %c0_i32_0 = arith.constant 0 : i32
    %c0_i32_1 = arith.constant 0 : i32
    return %arg0, %c0_i32, %c0_i32_0 : i32, i32, i32
  }
}

</mosaic_0001>

<bundles_post_ra>
// kernel: bottleneck_forward.1
= control target key start
LH: loop header
LB: loop body
LE: loop exit
PB: predicated region body
PF: predicated region fallthrough
CT: control target
= control target key end

     0   :  { %s6802_s24 = smov 0   ;;  %s8375_s0 = inlined_call_operand.vmem [shape: f32[2,32,256], index: 0, kind: input, shape index: {}]   ;;  %s8376_s1 = inlined_call_operand.vmem [shape: f32[8,32], index: 1, kind: input, shape index: {}]   ;;  %s8377_s2 = inlined_call_operand.vmem [shape: f32[8,1], index: 2, kind: input, shape index: {}]   ;;  %s8378_s3 = inlined_call_operand.vmem [shape: f32[9,8,8], index: 3, kind: input, shape index: {}]   ;;  %s8379_s4 = inlined_call_operand.vmem [shape: f32[1,8], index: 4, kind: input, shape index: {}]   ;;  %s8380_s5 = inlined_call_operand.vmem [shape: f32[8,32], index: 5, kind: input, shape index: {}]   ;;  %s8381_s6 = inlined_call_operand.vmem [shape: f32[32,1], index: 6, kind: input, shape index: {}]   ;;  %s8382_s7 = inlined_call_operand.vmem [shape: f32[2,32,256], index: 7, kind: output, shape index: {}]  }
   0x1 LB: > { %s5293_s25 = sadd.s32 4294967295, %s6758_s24   ;;  %p5297_p0 = scmp.ge.s32.totalorder %s6758_s24, 1  ;;  %s6758_s24 = sphi %s6802_s24, %s17_s24  }
   0x2   : > { %p237_p1 = scmp.lt.s32.totalorder %s6758_s24, 3 }
   0x4   : > { %p238_p2 = pnand %p5297_p0, %p237_p1 }
   0x6   : > { %241 = sbr.rel (%p238_p2) target bundleno = 1316 (0x524), region = 48 }
   0xd   : > { %p269_p3 = scmp.lt.s32.totalorder %s5293_s25, 1  ;;  %v288_v0 = vld [vmem:[%s8377_s2] sm:$0xff]  ;;  %v6760_v1 = vmov 0.0   ;;  %v6761_v2 = vmov 0   ;;  %vm294_vm0 = vcmask 261120   ;;  %vm435_vm1 = vcmask 64512  }
   0xe   : > { %362 = vmatprep.mubr.f32.mxu0 %v6760_v1  ;;  %6742 = vset.pattern.permute.xlu0 %v6761_v2  ;;  %v287_v15 = vld [vmem:[%s8376_s1] sm:$0xff]  ;;  %439 = vst.msk [vmem:[#allocation2 + $0x18] sm:$0xff] %vm435_vm1, %v6760_v1  ;;  %436 = vst.msk [vmem:[#allocation2] sm:$0xff] %vm435_vm1, %v6760_v1  ;;  %v5303_v23 = vld [vmem:[%s8378_s3 + $0x8] sm:$0xff]  ;;  %v506_v32 = vlaneseq  ;;  %v8525_v59 = vmov 0  ;;  %v8527_v60 = vmov 0 }
   0xf   : > { %s8773_s25 = smov (!%p269_p3, %s5293_s25), 1  ;;  %291 = vperm.xlu0 %6742, %v288_v0   ;;  %437 = vst.msk [vmem:[#allocation2 + $0x8] sm:$0xff] %vm435_vm1, %v6760_v1  ;;  %438 = vst.msk [vmem:[#allocation2 + $0x10] sm:$0xff] %vm435_vm1, %v6760_v1  ;;  %v6921_v26 = vld [vmem:[%s8378_s3 + $0x18] sm:$0xff]  ;;  %v6928_v27 = vld [vmem:[%s8378_s3 + $0x20] sm:$0xff]  ;;  %v8529_v61 = vmov 0 }
  0x10   : > { %s5634_s28 = sshll.u32 %s8773_s25, 6  ;;  %440 = vst.msk [vmem:[#allocation2 + $0x20] sm:$0xff] %vm435_vm1, %v6760_v1  ;;  %441 = vst.msk [vmem:[#allocation2 + $0x28] sm:$0xff] %vm435_vm1, %v6760_v1  ;;  %6474 = vmatprep.subr.mxu1 %v6921_v26  ;;  %v1115_v28 = vld [vmem:[%s8378_s3] sm:$0xff]  ;;  %v5184_v30 = vld [vmem:[%s8381_s6 + $0x10] sm:$0xff]  ;;  %v6943_v34 = vshrl.u32 %v506_v32, 7 }
  0x11   : > { %s6823_s8 = scalar_lea.vmem %s8375_s0, %s5634_s28  ;;  %442 = vst.msk [vmem:[#allocation2 + $0x30] sm:$0xff] %vm435_vm1, %v6760_v1  ;;  %443 = vst.msk [vmem:[#allocation2 + $0x38] sm:$0xff] %vm435_vm1, %v6760_v1  ;;  %6475 = vmatpush3.msra.mxu1 %v6921_v26  ;;  %v5182_v29 = vld [vmem:[%s8381_s6] sm:$0xff]  ;;  %v5185_v31 = vld [vmem:[%s8381_s6 + $0x18] sm:$0xff]  ;;  %s8355_s26 = scalar_lea.vmem %s8382_s7, %s5634_s28 }
  0x12   : > { %v280_v3 = vld [vmem:[%s6823_s8 + $0x8] sm:$0xff]  ;;  %v282_v4 = vld [vmem:[%s6823_s8 + $0x18] sm:$0xff]  ;;  %v279_v5 = vld [vmem:[%s6823_s8] sm:$0xff]  ;;  %444 = vst.msk [vmem:[#allocation2 + $0x40] sm:$0xff] %vm435_vm1, %v6760_v1  ;;  %6166 = vmatprep.subr.mxu1 %v6928_v27  ;;  %v543_v36 = vand.u32 15, %v6943_v34  ;;  %v523_v43 = vadd.s32 128, %v6943_v34 }
  0x13   : > { %v6466_v6 = vpack.c.bf16 %v282_v4, %v280_v3  ;;  %v281_v7 = vld [vmem:[%s6823_s8 + $0x10] sm:$0xff]  ;;  %v284_v8 = vld [vmem:[%s6823_s8 + $0x28] sm:$0xff]  ;;  %v286_v9 = vld [vmem:[%s6823_s8 + $0x38] sm:$0xff]  ;;  %445 = vst.msk [vmem:[#allocation2 + $0x48] sm:$0xff] %vm435_vm1, %v6760_v1  ;;  %v525_v44 = vadd.s32 144, %v6943_v34  ;;  %v522_v45 = vadd.s32 120, %v6943_v34 }
  0x14   : > { %v6468_v10 = vpack.c.bf16 %v281_v7, %v279_v5  ;;  %v6470_v11 = vpack.c.bf16 %v286_v9, %v284_v8  ;;  %v283_v12 = vld [vmem:[%s6823_s8 + $0x20] sm:$0xff]  ;;  %v285_v13 = vld [vmem:[%s6823_s8 + $0x30] sm:$0xff]  ;;  %446 = vst.msk [vmem:[#allocation2 + $0x50] sm:$0xff] %vm435_vm1, %v6760_v1  ;;  %447 = vst.msk [vmem:[#allocation2 + $0x58] sm:$0xff] %vm435_vm1, %v6760_v1  ;;  %vm6950_vm2 = vcmp.ge.s32.totalorder %v543_v36, 1  ;;  %v509_v48 = vadd.s32 16, %v6943_v34 }
  0x15   : > { %6467 = vmatprep.subr.bf16.mxu0 %v6466_v6  ;;  %v6472_v14 = vpack.c.bf16 %v285_v13, %v283_v12  ;;  %448 = vst.msk [vmem:[#allocation2 + $0x60] sm:$0xff] %vm435_vm1, %v6760_v1  ;;  %449 = vst.msk [vmem:[#allocation2 + $0x68] sm:$0xff] %vm435_vm1, %v6760_v1  ;;  %v655_v51 = vand.u32 15, %v523_v43  ;;  %v669_v52 = vand.u32 15, %v525_v44  ;;  %v648_v53 = vand.u32 15, %v522_v45 }
  0x16   : > { %6469 = vmatpush1.bf16.msra.mxu0 %v6468_v10  ;;  %450 = vst.msk [vmem:[#allocation2 + $0x70] sm:$0xff] %vm435_vm1, %v6760_v1  ;;  %451 = vst.msk [vmem:[#allocation2 + $0x78] sm:$0xff] %vm435_vm1, %v6760_v1  ;;  %v1116_v24 = vld [vmem:[#allocation2 + $0x8] sm:$0xff]  ;;  %v1117_v25 = vld [vmem:[#allocation2 + $0x10] sm:$0xff]  ;;  %v557_v55 = vand.u32 15, %v509_v48  ;;  %v527_v63 = vadd.s32 160, %v6943_v34 }
  0x17   : > { %6471 = vmatprep.subr.bf16.mxu0 %v6470_v11  ;;  %452 = vst.msk [vmem:[#allocation2 + $0x80] sm:$0xff] %vm435_vm1, %v6760_v1  ;;  %453 = vst.msk [vmem:[#allocation2 + $0x88] sm:$0xff] %vm435_vm1, %v6760_v1  ;;  %vm6979_vm3 = vcmp.ge.s32.totalorder %v655_v51, 1  ;;  %vm6983_vm4 = vcmp.ge.s32.totalorder %v669_v52, 1  ;;  %vm6987_vm5 = vcmp.le.s32.totalorder %v648_v53, 14  ;;  %v511_v4 = vadd.s32 32, %v6943_v34 }
  0x18   : > { %454 = vst.msk [vmem:[#allocation2 + $0x90] sm:$0xff] %vm435_vm1, %v6760_v1  ;;  %455 = vst.msk [vmem:[#allocation2 + $0x98] sm:$0xff] %vm435_vm1, %v6760_v1  ;;  %v8526_v59 = vsel %vm6979_vm3, 4294967295, %v8525_v59  ;;  %v8528_v60 = vsel %vm6983_vm4, 4294967295, %v8527_v60  ;;  %v8530_v61 = vsel %vm6987_vm5, 4294967295, %v8529_v61  ;;  %vm7001_vm6 = vcmp.ge.s32.totalorder %v557_v55, 1 }
  0x19   : > { %456 = vst.msk [vmem:[#allocation2 + $0xa0] sm:$0xff] %vm435_vm1, %v6760_v1  ;;  %457 = vst.msk [vmem:[#allocation2 + $0xa8] sm:$0xff] %vm435_vm1, %v6760_v1  ;;  %v508_v5 = vadd.s32 8, %v6943_v34  ;;  %v516_v36 = vadd.s32 72, %v6943_v34 }
  0x1a   : > { %6473 = vmatpush1.bf16.msra.mxu0 %v6472_v14  ;;  %458 = vst.msk [vmem:[#allocation2 + $0xb0] sm:$0xff] %vm435_vm1, %v6760_v1  ;;  %459 = vst.msk [vmem:[#allocation2 + $0xb8] sm:$0xff] %vm435_vm1, %v6760_v1  ;;  %v683_v14 = vand.u32 15, %v527_v63  ;;  %v528_v63 = vadd.s32 168, %v6943_v34 }
  0x1b   : > { %460 = vst.msk [vmem:[#allocation2 + $0xc0] sm:$0xff] %vm435_vm1, %v6760_v1  ;;  %461 = vst.msk [vmem:[#allocation2 + $0xc8] sm:$0xff] %vm435_vm1, %v6760_v1  ;;  %5966 = vmatprep.subr.mxu0 %v5303_v23 }
  0x1c   : > { %462 = vst.msk [vmem:[#allocation2 + $0xd0] sm:$0xff] %vm435_vm1, %v6760_v1  ;;  %463 = vst.msk [vmem:[#allocation2 + $0xd8] sm:$0xff] %vm435_vm1, %v6760_v1  ;;  %vm7038_vm7 = vcmp.ge.s32.totalorder %v683_v14, 1  ;;  %v8557_v14 = vmov 0 }
  0x1d   : > { %5302 = vmatmul.mubr.msk.f32.vlgmr.msra.gmra.mrb[0].mxu0 %vm294_vm0, %v287_v15  ;;  %464 = vst.msk [vmem:[#allocation2 + $0xe0] sm:$0xff] %vm435_vm1, %v6760_v1  ;;  %465 = vst.msk [vmem:[#allocation2 + $0xe8] sm:$0xff] %vm435_vm1, %v6760_v1 }
  0x1e   : > { %466 = vst.msk [vmem:[#allocation2 + $0xf0] sm:$0xff] %vm435_vm1, %v6760_v1  ;;  %467 = vst.msk [vmem:[#allocation2 + $0xf8] sm:$0xff] %vm435_vm1, %v6760_v1  ;;  %5968 = vmatprep.mubr.msk.f32.mxu0 %vm435_vm1, %v1116_v24  ;;  %5967 = vmatpush3.msra.mxu0 %v5303_v23  ;;  %v8536_v24 = vmov 0 }
  0x1f   : > { %468 = vst.msk [vmem:[#allocation2 + $0x100] sm:$0xff] %vm435_vm1, %v6760_v1  ;;  %469 = vst.msk [vmem:[#allocation2 + $0x108] sm:$0xff] %vm435_vm1, %v6760_v1  ;;  %6016 = vmatprep.subr.mxu0 %v1115_v28  ;;  %v8537_v24 = vsel %vm7038_vm7, 4294967295, %v8536_v24 }
  0x20   : > { %470 = vst.msk [vmem:[#allocation2 + $0x110] sm:$0xff] %vm435_vm1, %v6760_v1  ;;  %471 = vst.msk [vmem:[#allocation2 + $0x118] sm:$0xff] %vm435_vm1, %v6760_v1 }
  0x21   : > { %472 = vst.msk [vmem:[#allocation2 + $0x120] sm:$0xff] %vm435_vm1, %v6760_v1  ;;  %473 = vst.msk [vmem:[#allocation2 + $0x128] sm:$0xff] %vm435_vm1, %v6760_v1  ;;  %5969 = vmatmul.mubr.msk.f32.vlgmr.msra.gmra.mrb[2].mxu0 %vm435_vm1, %v1117_v25  ;;  %v524_v1 = vadd.s32 136, %v6943_v34  ;;  %v529_v25 = vadd.s32 176, %v6943_v34 }
  0x22   : > { %6017 = vmatpush3.msra.mxu0 %v1115_v28  ;;  %8522 = vst [vmem:[#allocation3_spill] sm:$0xff] %v6943_v34  ;;  %8531 = vst [vmem:[#allocation4_spill] sm:$0xff] %v8530_v61 }
  0x23   : > { %v662_v15 = vand.u32 15, %v524_v1  ;;  %8538 = vst [vmem:[#allocation7_spill] sm:$0xff] %v8537_v24  ;;  %v1792_v24 = vld [vmem:[#allocation2 + $0x9] sm:$0xff] }
  0x25   : > { %vm7046_vm8 = vcmp.le.s32.totalorder %v662_v15, 14 }
  0x8e   : > { %v292_v16 = vpop.permute.xlu0 %291 }
  0xf0   : > { %v364_v17 = vpop.f32.mrb[0].mxu0 }
  0xf1   : > { %v366_v18 = vpop.f32.mrb[1].mxu0  ;;  %v365_v19 = vadd.f32 %v364_v17, %v292_v16  ;;  %v550_v17 = vand.u32 15, %v508_v5  ;;  %v8553_v5 = vmov 0 }
  0xf2   : > { %v367_v20 = vadd.f32 %v366_v18, %v292_v16  ;;  %v571_v16 = vand.u32 15, %v511_v4  ;;  %v8550_v4 = vmov 0 }
  0xf3   : > { %v369_v21 = vmax.f32 %v365_v19, 0.0  ;;  %vm7058_vm10 = vcmp.le.s32.totalorder %v550_v17, 14  ;;  %v515_v17 = vadd.s32 64, %v6943_v34 }
  0xf4   : > { %v370_v22 = vmax.f32 %v367_v20, 0.0  ;;  %vm7053_vm9 = vcmp.ge.s32.totalorder %v571_v16, 1 }
  0xf5   : > { %371 = vxpose.xlu1.b32.start.end [1/1] (short) %v369_v21, 128 }
  0xf6   : > { %403 = vxpose.xlu0.b32.start.end [1/1] (short) %v370_v22, 128  ;;  %v526_v22 = vadd.s32 152, %v6943_v34 }
  0xf8   : > { %v676_v52 = vand.u32 15, %v526_v22  ;;  %v7123_v22 = vld [vmem:[%s8378_s3 + $0x10] sm:$0xff] }
  0xf9   : > { %6066 = vmatprep.subr.mxu0 %v7123_v22 }
  0xfa   : > { %vm7107_vm13 = vcmp.le.s32.totalorder %v676_v52, 14  ;;  %v8564_v52 = vmov 0 }
  0xfb   : > { %v8558_v14 = vsel %vm7107_vm13, 4294967295, %v8557_v14 }
  0xfc   : > { %8559 = vst [vmem:[#allocation16_spill] sm:$0xff] %v8558_v14 }
 0x113   : > { %6743 = vset.pattern.permute.xlu1 %v6761_v2 }
 0x15b   : > { %5188 = vperm.xlu0 %6742, %v5182_v29   ;;  %v510_v29 = vadd.s32 24, %v6943_v34 }
 0x15d   : > { %v564_v51 = vand.u32 15, %v510_v29 }
 0x15f   : > { %5198 = vperm.xlu0 %6742, %v5184_v30   ;;  %v8540_v30 = vmov 0  ;;  %vm7100_vm12 = vcmp.le.s32.totalorder %v564_v51, 14  ;;  %v690_v51 = vand.u32 15, %v528_v63 }
 0x160   : > { %v8541_v30 = vsel %vm7046_vm8, 4294967295, %v8540_v30  ;;  %v8554_v5 = vsel %vm7100_vm12, 4294967295, %v8553_v5 }
 0x161   : > { %8542 = vst [vmem:[#allocation9_spill] sm:$0xff] %v8541_v30  ;;  %8555 = vst [vmem:[#allocation14_spill] sm:$0xff] %v8554_v5  ;;  %vm7156_vm15 = vcmp.le.s32.totalorder %v690_v51, 14  ;;  %v530_v51 = vadd.s32 184, %v6943_v34 }
 0x162   : > { %v8565_v52 = vsel %vm7156_vm15, 4294967295, %v8564_v52 }
 0x163   : > { %5203 = vperm.xlu0 %6742, %v5185_v31   ;;  %8566 = vst [vmem:[#allocation19_spill] sm:$0xff] %v8565_v52 }
 0x175   : > { %v387_v33 = vpop.trf.xlu1 }
 0x176   : > { %474 = vst.msk [vmem:[#allocation2 + $0x18] sm:$0xff] %vm435_vm1, %v387_v33  ;;  %v419_v35 = vpop.trf.xlu0  ;;  %v513_v33 = vadd.s32 48, %v6943_v34 }
 0x177   : > { %490 = vst.msk [vmem:[#allocation2 + $0x98] sm:$0xff] %vm435_vm1, %v419_v35  ;;  %v8546_v35 = vmov 0 }
 0x178   : > { %v8547_v35 = vsel %vm7058_vm10, 4294967295, %v8546_v35  ;;  %v585_v53 = vand.u32 15, %v513_v33 }
 0x179   : > { %v388_v37 = vpop.trf.xlu1  ;;  %8548 = vst [vmem:[#allocation11_spill] sm:$0xff] %v8547_v35 }
 0x17a   : > { %475 = vst.msk [vmem:[#allocation2 + $0x20] sm:$0xff] %vm435_vm1, %v388_v37  ;;  %v420_v38 = vpop.trf.xlu0  ;;  %vm7114_vm14 = vcmp.ge.s32.totalorder %v585_v53, 1  ;;  %v532_v37 = vadd.s32 200, %v6943_v34 }
 0x17b   : > { %491 = vst.msk [vmem:[#allocation2 + $0xa0] sm:$0xff] %vm435_vm1, %v420_v38 }
 0x17c   : > { %v718_v6 = vand.u32 15, %v532_v37 }
 0x17d   : > { %v389_v40 = vpop.trf.xlu1  ;;  %v6954_v41 = vld [vmem:[#allocation2 + $0x18] sm:$0xff] }
 0x17e   : > { %v6956_v42 = vld [vmem:[#allocation2 + $0x17] sm:$0xff]  ;;  %476 = vst.msk [vmem:[#allocation2 + $0x28] sm:$0xff] %vm435_vm1, %v389_v40  ;;  %v421_v46 = vpop.trf.xlu0  ;;  %5971 = vmatprep.mubr.msk.f32.mxu0 %vm435_vm1, %v6954_v41  ;;  %v8574_v40 = vmov 0 }
 0x17f   : > { %492 = vst.msk [vmem:[#allocation2 + $0xa8] sm:$0xff] %vm435_vm1, %v421_v46 }
 0x181   : > { %v390_v49 = vpop.trf.xlu1  ;;  %v6969_v50 = vld [vmem:[#allocation2 + $0x20] sm:$0xff] }
 0x182   : > { %477 = vst.msk [vmem:[#allocation2 + $0x30] sm:$0xff] %vm435_vm1, %v390_v49  ;;  %v422_v54 = vpop.trf.xlu0  ;;  %5972 = vmatmul.mubr.msk.f32.gmra.mrb[4].mxu0 %vm435_vm1, %v6969_v50  ;;  %v697_v49 = vand.u32 15, %v529_v25 }
 0x183   : > { %493 = vst.msk [vmem:[#allocation2 + $0xb0] sm:$0xff] %vm435_vm1, %v422_v54 }
 0x184   : > { %vm7096_vm11 = vcmp.ge.s32.totalorder %v697_v49, 1 }
 0x185   : > { %v391_v56 = vpop.trf.xlu1  ;;  %v6975_v57 = vld [vmem:[#allocation2 + $0x28] sm:$0xff]  ;;  %v8551_v4 = vsel %vm7096_vm11, 4294967295, %v8550_v4 }
 0x186   : > { %v6977_v58 = vld [vmem:[#allocation2 + $0x27] sm:$0xff]  ;;  %478 = vst.msk [vmem:[#allocation2 + $0x38] sm:$0xff] %vm435_vm1, %v391_v56  ;;  %v423_v62 = vpop.trf.xlu0  ;;  %5974 = vmatprep.mubr.msk.f32.mxu0 %vm435_vm1, %v6975_v57  ;;  %8552 = vst [vmem:[#allocation13_spill] sm:$0xff] %v8551_v4 }
 0x187   : > { %v6995_v0 = vld [vmem:[#allocation2 + $0xa7] sm:$0xff]  ;;  %494 = vst.msk [vmem:[#allocation2 + $0xb8] sm:$0xff] %vm435_vm1, %v423_v62  ;;  %v8685_v39 = vsel %vm7001_vm6, %v6977_v58, 0.0 }
 0x188   : > { %v6998_v2 = vld [vmem:[#allocation2 + $0xa1] sm:$0xff] }
 0x189   : > { %8532 = vst [vmem:[#allocation5_spill] sm:$0xff] %v6998_v2  ;;  %v392_v11 = vpop.trf.xlu1  ;;  %v7022_v12 = vld [vmem:[#allocation2 + $0x30] sm:$0xff] }
 0x18a   : > { %479 = vst.msk [vmem:[#allocation2 + $0x40] sm:$0xff] %vm435_vm1, %v392_v11  ;;  %v424_v13 = vpop.trf.xlu0  ;;  %5975 = vmatmul.mubr.msk.f32.gmra.mrb[6].mxu0 %vm435_vm1, %v7022_v12  ;;  %v531_v11 = vadd.s32 192, %v6943_v34 }
 0x18b   : > { %495 = vst.msk [vmem:[#allocation2 + $0xc0] sm:$0xff] %vm435_vm1, %v424_v13 }
 0x18d   : > { %v393_v18 = vpop.trf.xlu1  ;;  %v7028_v19 = vld [vmem:[#allocation2 + $0x38] sm:$0xff] }
 0x18e   : > { %v7030_v20 = vld [vmem:[#allocation2 + $0x37] sm:$0xff]  ;;  %480 = vst.msk [vmem:[#allocation2 + $0x48] sm:$0xff] %vm435_vm1, %v393_v18  ;;  %v425_v23 = vpop.trf.xlu0  ;;  %5977 = vmatprep.mubr.msk.f32.mxu0 %vm435_vm1, %v7028_v19  ;;  %v512_v18 = vadd.s32 40, %v6943_v34 }
 0x18f   : > { %v7032_v21 = vld [vmem:[#allocation2 + $0x31] sm:$0xff]  ;;  %496 = vst.msk [vmem:[#allocation2 + $0xc8] sm:$0xff] %vm435_vm1, %v425_v23  ;;  %v8688_v3 = vsel %vm7053_vm9, %v7030_v20, 0.0 }
 0x190   : > { %8535 = vst [vmem:[#allocation6_spill] sm:$0xff] %v7032_v21  ;;  %v7043_v28 = vld [vmem:[#allocation2 + $0xb7] sm:$0xff]  ;;  %v578_v46 = vand.u32 15, %v512_v18 }
 0x191   : > { %8539 = vst [vmem:[#allocation8_spill] sm:$0xff] %v7043_v28  ;;  %v7050_v31 = vld [vmem:[#allocation2 + $0xb1] sm:$0xff]  ;;  %v394_v44 = vpop.trf.xlu1  ;;  %v7077_v45 = vld [vmem:[#allocation2 + $0x40] sm:$0xff] }
 0x192   : > { %8543 = vst [vmem:[#allocation10_spill] sm:$0xff] %v7050_v31  ;;  %481 = vst.msk [vmem:[#allocation2 + $0x50] sm:$0xff] %vm435_vm1, %v394_v44  ;;  %v426_v48 = vpop.trf.xlu0  ;;  %5978 = vmatmul.mubr.msk.f32.gmra.mrb[8].mxu0 %vm435_vm1, %v7077_v45  ;;  %vm7180_vm8 = vcmp.le.s32.totalorder %v578_v46, 14  ;;  %v606_v31 = vand.u32 15, %v516_v36  ;;  %v521_v36 = vadd.s32 112, %v6943_v34 }
 0x193   : > { %497 = vst.msk [vmem:[#allocation2 + $0xd0] sm:$0xff] %vm435_vm1, %v426_v48  ;;  %v8575_v40 = vsel %vm7180_vm8, 4294967295, %v8574_v40 }
 0x194   : > { %8576 = vst [vmem:[#allocation23_spill] sm:$0xff] %v8575_v40  ;;  %vm7295_vm11 = vcmp.le.s32.totalorder %v606_v31, 14  ;;  %v520_v31 = vadd.s32 104, %v6943_v34 }
 0x195   : > { %v395_v54 = vpop.trf.xlu1  ;;  %v7086_v55 = vld [vmem:[#allocation2 + $0x48] sm:$0xff] }
 0x196   : > { %v7088_v56 = vld [vmem:[#allocation2 + $0x47] sm:$0xff]  ;;  %482 = vst.msk [vmem:[#allocation2 + $0x58] sm:$0xff] %vm435_vm1, %v395_v54  ;;  %v427_v1 = vpop.trf.xlu0  ;;  %5980 = vmatprep.mubr.msk.f32.mxu0 %vm435_vm1, %v7086_v55  ;;  %v711_v54 = vand.u32 15, %v531_v11  ;;  %v8567_v11 = vmov 0 }
 0x197   : > { %v7090_v62 = vld [vmem:[#allocation2 + $0x41] sm:$0xff]  ;;  %498 = vst.msk [vmem:[#allocation2 + $0xd8] sm:$0xff] %vm435_vm1, %v427_v1  ;;  %v599_v1 = vand.u32 15, %v515_v17  ;;  %v533_v17 = vadd.s32 208, %v6943_v34  ;;  %v8692_v32 = vsel %vm7114_vm14, %v7088_v56, 0.0 }
 0x198   : > { %8549 = vst [vmem:[#allocation12_spill] sm:$0xff] %v7090_v62  ;;  %v7105_v13 = vld [vmem:[#allocation2 + $0xc7] sm:$0xff]  ;;  %vm7163_vm0 = vcmp.ge.s32.totalorder %v711_v54, 1  ;;  %v517_v54 = vadd.s32 80, %v6943_v34 }
 0x199   : > { %8556 = vst [vmem:[#allocation15_spill] sm:$0xff] %v7105_v13  ;;  %v7111_v15 = vld [vmem:[#allocation2 + $0xc1] sm:$0xff]  ;;  %v396_v48 = vpop.trf.xlu1  ;;  %v7141_v49 = vld [vmem:[#allocation2 + $0x50] sm:$0xff]  ;;  %v8568_v11 = vsel %vm7163_vm0, 4294967295, %v8567_v11  ;;  %vm7175_vm13 = vcmp.ge.s32.totalorder %v599_v1, 1  ;;  %v725_v1 = vand.u32 15, %v533_v17 }
 0x19a   : > { %8560 = vst [vmem:[#allocation17_spill] sm:$0xff] %v7111_v15  ;;  %483 = vst.msk [vmem:[#allocation2 + $0x60] sm:$0xff] %vm435_vm1, %v396_v48  ;;  %v428_v53 = vpop.trf.xlu0  ;;  %5981 = vmatmul.mubr.msk.f32.gmra.mrb[10].mxu0 %vm435_vm1, %v7141_v49  ;;  %v613_v7 = vand.u32 15, %v517_v54  ;;  %v8578_v17 = vmov 0  ;;  %v8585_v54 = vmov 0 }
 0x19b   : > { %499 = vst.msk [vmem:[#allocation2 + $0xe0] sm:$0xff] %vm435_vm1, %v428_v53  ;;  %8569 = vst [vmem:[#allocation20_spill] sm:$0xff] %v8568_v11  ;;  %v514_v53 = vadd.s32 56, %v6943_v34  ;;  %vm7218_vm15 = vcmp.ge.s32.totalorder %v725_v1, 1 }
 0x19c   : > { %v8579_v17 = vsel %vm7218_vm15, 4294967295, %v8578_v17  ;;  %vm7236_vm12 = vcmp.ge.s32.totalorder %v613_v7, 1 }
 0x19d   : > { %v397_v10 = vpop.trf.xlu1  ;;  %v7150_v44 = vld [vmem:[#allocation2 + $0x58] sm:$0xff]  ;;  %v592_v8 = vand.u32 15, %v514_v53  ;;  %8580 = vst [vmem:[#allocation25_spill] sm:$0xff] %v8579_v17  ;;  %v535_v53 = vadd.s32 224, %v6943_v34 }
 0x19e   : > { %v7152_v43 = vld [vmem:[#allocation2 + $0x57] sm:$0xff]  ;;  %484 = vst.msk [vmem:[#allocation2 + $0x68] sm:$0xff] %vm435_vm1, %v397_v10  ;;  %v429_v48 = vpop.trf.xlu0  ;;  %5983 = vmatprep.mubr.msk.f32.mxu0 %vm435_vm1, %v7150_v44 }
 0x19f   : > { %v7154_v63 = vld [vmem:[#allocation2 + $0x51] sm:$0xff]  ;;  %500 = vst.msk [vmem:[#allocation2 + $0xe8] sm:$0xff] %vm435_vm1, %v429_v48  ;;  %v704_v48 = vand.u32 15, %v530_v51  ;;  %vm7222_vm5 = vcmp.le.s32.totalorder %v592_v8, 14  ;;  %v519_v8 = vadd.s32 96, %v6943_v34  ;;  %v8698_v16 = vsel %vm7175_vm13, %v7152_v43, 0.0 }
 0x1a0   : > { %8563 = vst [vmem:[#allocation18_spill] sm:$0xff] %v7154_v63  ;;  %v7168_v18 = vld [vmem:[#allocation2 + $0xd7] sm:$0xff] }
 0x1a1   : > { %8570 = vst [vmem:[#allocation21_spill] sm:$0xff] %v7168_v18  ;;  %v7172_v33 = vld [vmem:[#allocation2 + $0xd1] sm:$0xff]  ;;  %v398_v25 = vpop.trf.xlu1  ;;  %v7199_v38 = vld [vmem:[#allocation2 + $0x60] sm:$0xff]  ;;  %vm7229_vm8 = vcmp.le.s32.totalorder %v704_v48, 14  ;;  %v627_v7 = vand.u32 15, %v519_v8  ;;  %v8592_v48 = vmov 0 }
 0x1a2   : > { %8571 = vst [vmem:[#allocation22_spill] sm:$0xff] %v7172_v33  ;;  %485 = vst.msk [vmem:[#allocation2 + $0x70] sm:$0xff] %vm435_vm1, %v398_v25  ;;  %v430_v29 = vpop.trf.xlu0  ;;  %5984 = vmatmul.mubr.msk.f32.gmra.mrb[12].mxu0 %vm435_vm1, %v7199_v38  ;;  %v8586_v54 = vsel %vm7229_vm8, 4294967295, %v8585_v54 }
 0x1a3   : > { %501 = vst.msk [vmem:[#allocation2 + $0xf0] sm:$0xff] %vm435_vm1, %v430_v29  ;;  %v8581_v29 = vmov 0  ;;  %8587 = vst [vmem:[#allocation28_spill] sm:$0xff] %v8586_v54  ;;  %vm7291_vm0 = vcmp.ge.s32.totalorder %v627_v7, 1  ;;  %v8602_v54 = vmov 0 }
 0x1a4   : > { %v8582_v29 = vsel %vm7222_vm5, 4294967295, %v8581_v29  ;;  %vm7272_vm5 = vcmp.le.s32.totalorder %v718_v6, 14  ;;  %v534_v6 = vadd.s32 216, %v6943_v34  ;;  %v8603_v54 = vsel %vm7295_vm11, 4294967295, %v8602_v54 }
 0x1a5   : > { %v399_v46 = vpop.trf.xlu1  ;;  %v7208_v47 = vld [vmem:[#allocation2 + $0x68] sm:$0xff]  ;;  %8583 = vst [vmem:[#allocation26_spill] sm:$0xff] %v8582_v29  ;;  %v8593_v48 = vsel %vm7272_vm5, 4294967295, %v8592_v48  ;;  %8604 = vst [vmem:[#allocation35_spill] sm:$0xff] %v8603_v54  ;;  %v536_v54 = vadd.s32 232, %v6943_v34 }
 0x1a6   : > { %v7210_v9 = vld [vmem:[#allocation2 + $0x67] sm:$0xff]  ;;  %486 = vst.msk [vmem:[#allocation2 + $0x78] sm:$0xff] %vm435_vm1, %v399_v46  ;;  %v431_v25 = vpop.trf.xlu0  ;;  %5986 = vmatprep.mubr.msk.f32.mxu0 %vm435_vm1, %v7208_v47  ;;  %8594 = vst [vmem:[#allocation31_spill] sm:$0xff] %v8593_v48 }
 0x1a7   : > { %v7212_v23 = vld [vmem:[#allocation2 + $0x61] sm:$0xff]  ;;  %502 = vst.msk [vmem:[#allocation2 + $0xf8] sm:$0xff] %vm435_vm1, %v431_v25  ;;  %v739_v25 = vand.u32 15, %v535_v53  ;;  %v8595_v53 = vmov 0  ;;  %v8704_v10 = vsel %vm7236_vm12, %v7210_v9, 0.0 }
 0x1a8   : > { %8577 = vst [vmem:[#allocation24_spill] sm:$0xff] %v7212_v23  ;;  %v7227_v51 = vld [vmem:[#allocation2 + $0xe7] sm:$0xff] }
 0x1a9   : > { %8584 = vst [vmem:[#allocation27_spill] sm:$0xff] %v7227_v51  ;;  %v7233_v46 = vld [vmem:[#allocation2 + $0xe1] sm:$0xff]  ;;  %v400_v52 = vpop.trf.xlu1  ;;  %v7257_v15 = vld [vmem:[#allocation2 + $0x70] sm:$0xff]  ;;  %vm7281_vm8 = vcmp.ge.s32.totalorder %v739_v25, 1  ;;  %v518_v25 = vadd.s32 88, %v6943_v34 }
 0x1aa   : > { %8588 = vst [vmem:[#allocation29_spill] sm:$0xff] %v7233_v46  ;;  %487 = vst.msk [vmem:[#allocation2 + $0x80] sm:$0xff] %vm435_vm1, %v400_v52  ;;  %v432_v14 = vpop.trf.xlu0  ;;  %5987 = vmatmul.mubr.msk.f32.gmra.mrb[14].mxu0 %vm435_vm1, %v7257_v15  ;;  %v8596_v53 = vsel %vm7281_vm8, 4294967295, %v8595_v53 }
 0x1ab   : > { %503 = vst.msk [vmem:[#allocation2 + $0x100] sm:$0xff] %vm435_vm1, %v432_v14  ;;  %v537_v14 = vadd.s32 240, %v6943_v34  ;;  %8597 = vst [vmem:[#allocation32_spill] sm:$0xff] %v8596_v53  ;;  %v5467_v34 = vld [vmem:[%s8378_s3 + $0x28] sm:$0xff] }
 0x1ad   : > { %v401_v33 = vpop.trf.xlu1  ;;  %v7266_v30 = vld [vmem:[#allocation2 + $0x78] sm:$0xff]  ;;  %v753_v7 = vand.u32 15, %v537_v14 }
 0x1ae   : > { %v7268_v2 = vld [vmem:[#allocation2 + $0x77] sm:$0xff]  ;;  %488 = vst.msk [vmem:[#allocation2 + $0x88] sm:$0xff] %vm435_vm1, %v401_v33  ;;  %v433_v52 = vpop.trf.xlu0  ;;  %5989 = vmatprep.mubr.msk.f32.mxu0 %vm435_vm1, %v7266_v30  ;;  %v8600_v33 = vmov 0 }
 0x1af   : > { %v7270_v37 = vld [vmem:[#allocation2 + $0x71] sm:$0xff]  ;;  %504 = vst.msk [vmem:[#allocation2 + $0x108] sm:$0xff] %vm435_vm1, %v433_v52  ;;  %v8601_v33 = vsel %vm7291_vm0, 4294967295, %v8600_v33  ;;  %v641_v52 = vand.u32 15, %v521_v36  ;;  %vm7332_vm5 = vcmp.ge.s32.totalorder %v753_v7, 1  ;;  %v8614_v7 = vmov 0 }
 0x1b0   : > { %8591 = vst [vmem:[#allocation30_spill] sm:$0xff] %v7270_v37  ;;  %v7285_v8 = vld [vmem:[#allocation2 + $0xf7] sm:$0xff]  ;;  %v620_v37 = vand.u32 15, %v518_v25 }
 0x1b1   : > { %8598 = vst [vmem:[#allocation33_spill] sm:$0xff] %v7285_v8  ;;  %v7288_v46 = vld [vmem:[#allocation2 + $0xf1] sm:$0xff]  ;;  %v402_v51 = vpop.trf.xlu1  ;;  %v7315_v29 = vld [vmem:[#allocation2 + $0x80] sm:$0xff]  ;;  %v732_v8 = vand.u32 15, %v534_v6  ;;  %v634_v6 = vand.u32 15, %v520_v31  ;;  %vm7346_vm8 = vcmp.ge.s32.totalorder %v641_v52, 1 }
 0x1b2   : > { %8599 = vst [vmem:[#allocation34_spill] sm:$0xff] %v7288_v46  ;;  %489 = vst.msk [vmem:[#allocation2 + $0x90] sm:$0xff] %vm435_vm1, %v402_v51  ;;  %v434_v23 = vpop.trf.xlu0  ;;  %5990 = vmatmul.mubr.msk.f32.gmra.mrb[16].mxu0 %vm435_vm1, %v7315_v29  ;;  %v8605_v51 = vmov 0  ;;  %v8612_v46 = vmov 0  ;;  %vm7350_vm15 = vcmp.le.s32.totalorder %v620_v37, 14  ;;  %v746_v31 = vand.u32 15, %v536_v54 }
 0x1b3   : > { %505 = vst.msk [vmem:[#allocation2 + $0x110] sm:$0xff] %vm435_vm1, %v434_v23  ;;  %v8606_v51 = vsel %vm7332_vm5, 4294967295, %v8605_v51  ;;  %vm7338_vm11 = vcmp.le.s32.totalorder %v732_v8, 14  ;;  %v8608_v23 = vmov 0  ;;  %v8613_v46 = vsel %vm7346_vm8, 4294967295, %v8612_v46  ;;  %v7373_v54 = vld [vmem:[#allocation2 + $0x98] sm:$0xff] }
 0x1b4   : > { %8607 = vst [vmem:[#allocation36_spill] sm:$0xff] %v8606_v51  ;;  %v8609_v23 = vsel %vm7338_vm11, 4294967295, %v8608_v23  ;;  %v8615_v7 = vsel %vm7350_vm15, 4294967295, %v8614_v7  ;;  %v8617_v52 = vmov 0  ;;  %vm7398_vm11 = vcmp.le.s32.totalorder %v746_v31, 14  ;;  %v1135_v37 = vld [vmem:[#allocation2 + $0xa0] sm:$0xff] }
 0x1b5   : > { %v7326_v53 = vld [vmem:[#allocation2 + $0x88] sm:$0xff]  ;;  %8610 = vst [vmem:[#allocation37_spill] sm:$0xff] %v8609_v23  ;;  %8616 = vst [vmem:[#allocation39_spill] sm:$0xff] %v8615_v7  ;;  %v1137_v31 = vld [vmem:[#allocation2 + $0xb0] sm:$0xff] }
 0x1b6   : > { %v7328_v48 = vld [vmem:[#allocation2 + $0x87] sm:$0xff]  ;;  %5992 = vmatprep.mubr.msk.f32.mxu0 %vm435_vm1, %v7326_v53 }
 0x1b7   : > { %v7330_v61 = vld [vmem:[#allocation2 + $0x81] sm:$0xff] }
 0x1b8   : > { %v2305_v14 = vld [vmem:[#allocation2 + $0x107] sm:$0xff] }
 0x1b9   : > { %v7342_v36 = vld [vmem:[#allocation2 + $0x101] sm:$0xff]  ;;  %v2337_v25 = vsel %vm7332_vm5, %v2305_v14, 0.0  ;;  %v7367_v14 = vld [vmem:[#allocation2 + $0x90] sm:$0xff]  ;;  %vm7378_vm5 = vcmp.le.s32.totalorder %v634_v6, 14  ;;  %v8620_v6 = vmov 0 }
 0x1ba   : > { %8611 = vst [vmem:[#allocation38_spill] sm:$0xff] %v7342_v36  ;;  %6163 = vmatprep.mubr.msk.f32.mxu1 %vm435_vm1, %v2337_v25  ;;  %v7369_v51 = vld [vmem:[#allocation2 + $0x97] sm:$0xff]  ;;  %5993 = vmatmul.mubr.msk.f32.gmra.mrb[18].mxu0 %vm435_vm1, %v7367_v14  ;;  %v2306_v25 = vld [vmem:[#allocation2 + $0x10f] sm:$0xff]  ;;  %v8618_v52 = vsel %vm7378_vm5, 4294967295, %v8617_v52  ;;  %v8621_v6 = vsel %vm7398_vm11, 4294967295, %v8620_v6  ;;  %v1139_v8 = vld [vmem:[#allocation2 + $0xc0] sm:$0xff] }
 0x1bb   : > { %8619 = vst [vmem:[#allocation40_spill] sm:$0xff] %v8618_v52  ;;  %5995 = vmatprep.mubr.msk.f32.mxu0 %vm435_vm1, %v7373_v54  ;;  %6164 = vmatmul.mubr.msk.f32.vlgmr.msra.gmra.mrb[0].mxu1 %vm435_vm1, %v2306_v25  ;;  %v7391_v36 = vld [vmem:[#allocation2 + $0x91] sm:$0xff] }
 0x1bc   : > { %v7393_v23 = vld [vmem:[#allocation2 + $0x111] sm:$0xff]  ;;  %6167 = vmatpush3.msra.mxu1 %v6928_v27  ;;  %6168 = vmatprep.mubr.msk.f32.mxu1 %vm435_vm1, %v6954_v41  ;;  %v1136_v27 = vld [vmem:[#allocation2 + $0xa8] sm:$0xff] }
 0x1bd   : > { %6216 = vmatprep.subr.mxu1 %v5467_v34  ;;  %v7412_v41 = vld [vmem:[%s8378_s3 + $0x30] sm:$0xff]  ;;  %v1138_v25 = vld [vmem:[#allocation2 + $0xb8] sm:$0xff] }
 0x1be   : > { %5996 = vmatmul.mubr.msk.f32.gmra.mrb[20].mxu0 %vm435_vm1, %v1135_v37 }
 0x1bf   : > { %5998 = vmatprep.mubr.msk.f32.mxu0 %vm435_vm1, %v1136_v27  ;;  %6169 = vmatmul.mubr.msk.f32.vlgmr.msra.gmra.mrb[2].mxu1 %vm435_vm1, %v6969_v50  ;;  %v1141_v50 = vld [vmem:[#allocation2 + $0xd0] sm:$0xff] }
 0x1c0   : > { %6217 = vmatpush3.msra.mxu1 %v5467_v34  ;;  %6171 = vmatprep.mubr.msk.f32.mxu1 %vm435_vm1, %v6975_v57  ;;  %v1140_v34 = vld [vmem:[#allocation2 + $0xc8] sm:$0xff]  ;;  %v1142_v57 = vld [vmem:[#allocation2 + $0xd8] sm:$0xff] }
 0x1c1   : > { %6266 = vmatprep.subr.mxu1 %v7412_v41 }
 0x1c2   : > { %5999 = vmatmul.mubr.msk.f32.gmra.mrb[22].mxu0 %vm435_vm1, %v1137_v31 }
 0x1c3   : > { %6001 = vmatprep.mubr.msk.f32.mxu0 %vm435_vm1, %v1138_v25  ;;  %6172 = vmatmul.mubr.msk.f32.gmra.mrb[4].mxu1 %vm435_vm1, %v7022_v12  ;;  %v1143_v12 = vld [vmem:[#allocation2 + $0xe0] sm:$0xff] }
 0x1c4   : > { %6174 = vmatprep.mubr.msk.f32.mxu1 %vm435_vm1, %v7028_v19  ;;  %v1144_v19 = vld [vmem:[#allocation2 + $0xe8] sm:$0xff] }
 0x1c6   : > { %6002 = vmatmul.mubr.msk.f32.gmra.mrb[24].mxu0 %vm435_vm1, %v1139_v8 }
 0x1c7   : > { %6004 = vmatprep.mubr.msk.f32.mxu0 %vm435_vm1, %v1140_v34  ;;  %6175 = vmatmul.mubr.msk.f32.gmra.mrb[6].mxu1 %vm435_vm1, %v7077_v45  ;;  %v1145_v45 = vld [vmem:[#allocation2 + $0xf0] sm:$0xff] }
 0x1c8   : > { %6177 = vmatprep.mubr.msk.f32.mxu1 %vm435_vm1, %v7086_v55  ;;  %v987_v55 = vld [vmem:[#allocation2 + $0x7] sm:$0xff] }
 0x1ca   : > { %6005 = vmatmul.mubr.msk.f32.gmra.mrb[26].mxu0 %vm435_vm1, %v1141_v50 }
 0x1cb   : > { %6007 = vmatprep.mubr.msk.f32.mxu0 %vm435_vm1, %v1142_v57  ;;  %6178 = vmatmul.mubr.msk.f32.gmra.mrb[8].mxu1 %vm435_vm1, %v7141_v49  ;;  %v1146_v49 = vld [vmem:[#allocation2 + $0xf8] sm:$0xff] }
 0x1cc   : > { %6180 = vmatprep.mubr.msk.f32.mxu1 %vm435_vm1, %v7150_v44  ;;  %v1083_v44 = vsel %vm6950_vm2, %v987_v55, 0.0  ;;  %v7549_v55 = vld [vmem:[#allocation2 + $0x110] sm:$0xff] }
 0x1cd   : > { %8623 = vst [vmem:[#allocation42_spill] sm:$0xff] %v7549_v55 }
 0x1ce   : > { %6008 = vmatmul.mubr.msk.f32.gmra.mrb[28].mxu0 %vm435_vm1, %v1143_v12 }
 0x1cf   : > { %6010 = vmatprep.mubr.msk.f32.mxu0 %vm435_vm1, %v1144_v19  ;;  %6181 = vmatmul.mubr.msk.f32.gmra.mrb[10].mxu1 %vm435_vm1, %v7199_v38  ;;  %v1147_v38 = vld [vmem:[#allocation2 + $0x100] sm:$0xff] }
 0x1d0   : > { %6183 = vmatprep.mubr.msk.f32.mxu1 %vm435_vm1, %v7208_v47  ;;  %v988_v47 = vld [vmem:[#allocation2 + $0xf] sm:$0xff] }
 0x1d2   : > { %6011 = vmatmul.mubr.msk.f32.gmra.mrb[30].mxu0 %vm435_vm1, %v1145_v45 }
 0x1d3   : > { %6013 = vmatprep.mubr.msk.f32.mxu0 %vm435_vm1, %v1146_v49  ;;  %6184 = vmatmul.mubr.msk.f32.gmra.mrb[12].mxu1 %vm435_vm1, %v7257_v15  ;;  %v7468_v15 = vld [vmem:[#allocation2 + $0x1f] sm:$0xff] }
 0x1d4   : > { %6186 = vmatprep.mubr.msk.f32.mxu1 %vm435_vm1, %v7266_v30  ;;  %v1085_v30 = vsel %vm7001_vm6, %v6956_v42, 0.0 }
 0x1d6   : > { %6014 = vmatmul.mubr.msk.f32.gmra.mrb[32].mxu0 %vm435_vm1, %v1147_v38 }
 0x1d7   : > { %6187 = vmatmul.mubr.msk.f32.gmra.mrb[14].mxu1 %vm435_vm1, %v7315_v29  ;;  %6018 = vmatprep.mubr.msk.f32.mxu0 %vm435_vm1, %v1083_v44  ;;  %v1087_v29 = vsel %vm7053_vm9, %v6977_v58, 0.0  ;;  %v7556_v44 = vld [vmem:[#allocation2 + $0x21] sm:$0xff] }
 0x1d8   : > { %6189 = vmatprep.mubr.msk.f32.mxu1 %vm435_vm1, %v7326_v53  ;;  %v7479_v53 = vld [vmem:[#allocation2 + $0x2f] sm:$0xff] }
 0x1da   : > { %6019 = vmatmul.mubr.msk.f32.vlgmr.msra.gmra.mrb[2].mxu0 %vm435_vm1, %v988_v47  ;;  %v1103_v47 = vsel %vm7038_vm7, %v6995_v0, 0.0  ;;  %vm8625_vm7 = vnez %v8551_v4  ;;  %v8642_v4 = vld [vmem:[#allocation35_spill] sm:$0xff] }
 0x1db   : > { %6021 = vmatprep.mubr.msk.f32.mxu0 %vm435_vm1, %v1085_v30  ;;  %6190 = vmatmul.mubr.msk.f32.gmra.mrb[16].mxu1 %vm435_vm1, %v7367_v14  ;;  %v7489_v14 = vld [vmem:[#allocation2 + $0x3f] sm:$0xff]  ;;  %v3114_v30 = vsel %vm7058_vm10, %v7556_v44, 0.0 }
 0x1dc   : > { %6192 = vmatprep.mubr.msk.f32.mxu1 %vm435_vm1, %v7373_v54  ;;  %6067 = vmatpush3.msra.mxu0 %v7123_v22  ;;  %v1089_v22 = vsel %vm7114_vm14, %v7030_v20, 0.0  ;;  %v7499_v54 = vld [vmem:[#allocation2 + $0x4f] sm:$0xff] }
 0x1dd   : > { %6116 = vmatprep.subr.mxu0 %v6921_v26 }
 0x1de   : > { %6022 = vmatmul.mubr.msk.f32.gmra.mrb[4].mxu0 %vm435_vm1, %v7468_v15 }
 0x1df   : > { %6024 = vmatprep.mubr.msk.f32.mxu0 %vm435_vm1, %v1087_v29  ;;  %6193 = vmatmul.mubr.msk.f32.gmra.mrb[18].mxu1 %vm435_vm1, %v1135_v37  ;;  %v1091_v37 = vsel %vm7175_vm13, %v7088_v56, 0.0  ;;  %v7573_v29 = vld [vmem:[%s8378_s3 + $0x38] sm:$0xff] }
 0x1e0   : > { %6195 = vmatprep.mubr.msk.f32.mxu1 %vm435_vm1, %v1136_v27  ;;  %v7509_v27 = vld [vmem:[#allocation2 + $0x5f] sm:$0xff] }
 0x1e2   : > { %6025 = vmatmul.mubr.msk.f32.gmra.mrb[6].mxu0 %vm435_vm1, %v7479_v53 }
 0x1e3   : > { %6027 = vmatprep.mubr.msk.f32.mxu0 %vm435_vm1, %v1089_v22  ;;  %6196 = vmatmul.mubr.msk.f32.gmra.mrb[20].mxu1 %vm435_vm1, %v1137_v31  ;;  %v7519_v31 = vld [vmem:[#allocation2 + $0x6f] sm:$0xff] }
 0x1e4   : > { %6198 = vmatprep.mubr.msk.f32.mxu1 %vm435_vm1, %v1138_v25  ;;  %v1093_v25 = vsel %vm7236_vm12, %v7152_v43, 0.0  ;;  %v7577_v22 = vld [vmem:[#allocation2 + $0x29] sm:$0xff] }
 0x1e5   : > { %8624 = vst [vmem:[#allocation43_spill] sm:$0xff] %v7577_v22 }
 0x1e6   : > { %6028 = vmatmul.mubr.msk.f32.gmra.mrb[8].mxu0 %vm435_vm1, %v7489_v14 }
 0x1e7   : > { %6030 = vmatprep.mubr.msk.f32.mxu0 %vm435_vm1, %v1091_v37  ;;  %6199 = vmatmul.mubr.msk.f32.gmra.mrb[22].mxu1 %vm435_vm1, %v1139_v8  ;;  %v1095_v8 = vsel %vm7291_vm0, %v7210_v9, 0.0  ;;  %v7582_v37 = vld [vmem:[#allocation2 + $0xaf] sm:$0xff]  ;;  %vm8643_vm0 = vnez %v8642_v4 }
 0x1e8   : > { %6201 = vmatprep.mubr.msk.f32.mxu1 %vm435_vm1, %v1140_v34  ;;  %v1097_v34 = vsel %vm7346_vm8, %v7268_v2, 0.0 }
 0x1ea   : > { %6031 = vmatmul.mubr.msk.f32.gmra.mrb[10].mxu0 %vm435_vm1, %v7499_v54 }
 0x1eb   : > { %6033 = vmatprep.mubr.msk.f32.mxu0 %vm435_vm1, %v1093_v25  ;;  %6202 = vmatmul.mubr.msk.f32.gmra.mrb[24].mxu1 %vm435_vm1, %v1141_v50  ;;  %v7529_v50 = vld [vmem:[#allocation2 + $0x7f] sm:$0xff]  ;;  %v1105_v25 = vsel %vm8625_vm7, %v7043_v28, 0.0  ;;  %vm8629_vm7 = vnez %v8568_v11 }
 0x1ec   : > { %6204 = vmatprep.mubr.msk.f32.mxu1 %vm435_vm1, %v1142_v57  ;;  %v1099_v57 = vsel %vm6979_vm3, %v7328_v48, 0.0  ;;  %vm8630_vm3 = vnez %v8575_v40 }
 0x1ee   : > { %6034 = vmatmul.mubr.msk.f32.gmra.mrb[12].mxu0 %vm435_vm1, %v7509_v27 }
 0x1ef   : > { %6036 = vmatprep.mubr.msk.f32.mxu0 %vm435_vm1, %v1095_v8  ;;  %6205 = vmatmul.mubr.msk.f32.gmra.mrb[26].mxu1 %vm435_vm1, %v1143_v12  ;;  %v7538_v12 = vld [vmem:[#allocation2 + $0x108] sm:$0xff] }
 0x1f0   : > { %6207 = vmatprep.mubr.msk.f32.mxu1 %vm435_vm1, %v1144_v19  ;;  %8622 = vst [vmem:[#allocation41_spill] sm:$0xff] %v7538_v12  ;;  %v7542_v19 = vld [vmem:[#allocation2 + $0x8f] sm:$0xff] }
 0x1f2   : > { %6037 = vmatmul.mubr.msk.f32.gmra.mrb[14].mxu0 %vm435_vm1, %v7519_v31 }
 0x1f3   : > { %6039 = vmatprep.mubr.msk.f32.mxu0 %vm435_vm1, %v1097_v34  ;;  %6208 = vmatmul.mubr.msk.f32.gmra.mrb[28].mxu1 %vm435_vm1, %v1145_v45  ;;  %v1101_v45 = vsel %vm6983_vm4, %v7369_v51, 0.0  ;;  %vm8626_vm4 = vnez %v8554_v5  ;;  %v7599_v34 = vld [vmem:[#allocation2 + $0xbf] sm:$0xff]  ;;  %v8659_v5 = vld [vmem:[#allocation19_spill] sm:$0xff] }
 0x1f4   : > { %6210 = vmatprep.mubr.msk.f32.mxu1 %vm435_vm1, %v1146_v49  ;;  %v7554_v49 = vld [vmem:[#allocation2 + $0x19] sm:$0xff]  ;;  %v3116_v8 = vsel %vm8626_vm4, %v7032_v21, 0.0  ;;  %8628 = vst [vmem:[#allocation45_spill] sm:$0xff] %v7599_v34 }
 0x1f6   : > { %6040 = vmatmul.mubr.msk.f32.gmra.mrb[16].mxu0 %vm435_vm1, %v7529_v50 }
 0x1f7   : > { %6042 = vmatprep.mubr.msk.f32.mxu0 %vm435_vm1, %v1099_v57  ;;  %6211 = vmatmul.mubr.msk.f32.gmra.mrb[30].mxu1 %vm435_vm1, %v1147_v38  ;;  %v7560_v38 = vld [vmem:[#allocation2 + $0x9f] sm:$0xff]  ;;  %v1107_v57 = vsel %vm8629_vm7, %v7105_v13, 0.0  ;;  %vm8633_vm7 = vnez %v8579_v17  ;;  %v8648_v13 = vld [vmem:[#allocation30_spill] sm:$0xff] }
 0x1f8   : > { %6213 = vmatprep.mubr.msk.f32.mxu1 %vm435_vm1, %v7538_v12  ;;  %v8638_v12 = vld [vmem:[#allocation27_spill] sm:$0xff]  ;;  %v8639_v17 = vld [vmem:[#allocation32_spill] sm:$0xff]  ;;  %v1901_v7 = vsel %vm7378_vm5, %v8648_v13, 0.0 }
 0x1fa   : > { %6043 = vmatmul.mubr.msk.f32.gmra.mrb[18].mxu0 %vm435_vm1, %v7542_v19 }
 0x1fb   : > { %6045 = vmatprep.mubr.msk.f32.mxu0 %vm435_vm1, %v1101_v45  ;;  %6214 = vmatmul.mubr.msk.f32.gmra.mrb[0].mxu1 %vm435_vm1, %v7549_v55  ;;  %v3118_v45 = vsel %vm8630_vm3, %v7090_v62, 0.0  ;;  %v7631_v55 = vld [vmem:[#allocation2 + $0xdf] sm:$0xff] }
 0x1fc   : > { %6218 = vmatprep.mubr.msk.f32.mxu1 %vm435_vm1, %v7554_v49  ;;  %8637 = vst [vmem:[#allocation49_spill] sm:$0xff] %v7631_v55 }
 0x1fe   : > { %6046 = vmatmul.mubr.msk.f32.gmra.mrb[20].mxu0 %vm435_vm1, %v7560_v38 }
 0x1ff   : > { %6048 = vmatprep.mubr.msk.f32.mxu0 %vm435_vm1, %v1103_v47  ;;  %6219 = vmatmul.mubr.msk.f32.vlgmr.msra.gmra.mrb[2].mxu1 %vm435_vm1, %v3114_v30  ;;  %v7611_v47 = vld [vmem:[#allocation2 + $0x49] sm:$0xff] }
 0x200   : > { %6267 = vmatpush3.msra.mxu1 %v7412_v41  ;;  %6221 = vmatprep.mubr.msk.f32.mxu1 %vm435_vm1, %v7577_v22  ;;  %v7595_v41 = vld [vmem:[#allocation2 + $0x39] sm:$0xff]  ;;  %8631 = vst [vmem:[#allocation46_spill] sm:$0xff] %v7611_v47  ;;  %v7615_v30 = vld [vmem:[#allocation2 + $0xcf] sm:$0xff] }
 0x201   : > { %6316 = vmatprep.subr.mxu1 %v7573_v29  ;;  %8627 = vst [vmem:[#allocation44_spill] sm:$0xff] %v7595_v41  ;;  %8632 = vst [vmem:[#allocation47_spill] sm:$0xff] %v7615_v30 }
 0x202   : > { %6049 = vmatmul.mubr.msk.f32.gmra.mrb[22].mxu0 %vm435_vm1, %v7582_v37 }
 0x203   : > { %6051 = vmatprep.mubr.msk.f32.mxu0 %vm435_vm1, %v1105_v25  ;;  %6222 = vmatmul.mubr.msk.f32.gmra.mrb[4].mxu1 %vm435_vm1, %v3116_v8  ;;  %v1109_v25 = vsel %vm8633_vm7, %v7168_v18, 0.0  ;;  %v8634_v8 = vld [vmem:[#allocation26_spill] sm:$0xff]  ;;  %vm8640_vm7 = vnez %v8639_v17  ;;  %v8641_v18 = vld [vmem:[#allocation24_spill] sm:$0xff]  ;;  %v8645_v17 = vld [vmem:[#allocation33_spill] sm:$0xff] }
 0x204   : > { %6224 = vmatprep.mubr.msk.f32.mxu1 %vm435_vm1, %v7595_v41  ;;  %vm8635_vm8 = vnez %v8634_v8  ;;  %v1111_v11 = vsel %vm8640_vm7, %v8638_v12, 0.0  ;;  %v8646_v12 = vld [vmem:[#allocation36_spill] sm:$0xff]  ;;  %v1897_v8 = vsel %vm8643_vm0, %v7154_v63, 0.0  ;;  %v1899_v4 = vsel %vm7350_vm15, %v8641_v18, 0.0 }
 0x205   : > { %vm8647_vm7 = vnez %v8646_v12  ;;  %v3126_v12 = vsel %vm7378_vm5, %v7330_v61, 0.0  ;;  %v1895_v40 = vsel %vm8635_vm8, %v7090_v62, 0.0  ;;  %v8662_v62 = vld [vmem:[#allocation28_spill] sm:$0xff] }
 0x206   : > { %6052 = vmatmul.mubr.msk.f32.gmra.mrb[24].mxu0 %vm435_vm1, %v7599_v34  ;;  %v7663_v34 = vld [vmem:[#allocation2 + $0xff] sm:$0xff] }
 0x207   : > { %6054 = vmatprep.mubr.msk.f32.mxu0 %vm435_vm1, %v1107_v57  ;;  %6225 = vmatmul.mubr.msk.f32.gmra.mrb[6].mxu1 %vm435_vm1, %v3118_v45  ;;  %v3120_v57 = vsel %vm8635_vm8, %v7154_v63, 0.0  ;;  %v7627_v45 = vld [vmem:[#allocation2 + $0x59] sm:$0xff]  ;;  %8649 = vst [vmem:[#allocation51_spill] sm:$0xff] %v7663_v34  ;;  %vm8663_vm8 = vnez %v8662_v62  ;;  %v8665_v63 = vld [vmem:[#allocation31_spill] sm:$0xff] }
 0x208   : > { %6227 = vmatprep.mubr.msk.f32.mxu1 %vm435_vm1, %v7611_v47  ;;  %8636 = vst [vmem:[#allocation48_spill] sm:$0xff] %v7627_v45 }
 0x20a   : > { %6055 = vmatmul.mubr.msk.f32.gmra.mrb[26].mxu0 %vm435_vm1, %v7615_v30  ;;  %v7647_v30 = vld [vmem:[#allocation2 + $0xef] sm:$0xff] }
 0x20b   : > { %6057 = vmatprep.mubr.msk.f32.mxu0 %vm435_vm1, %v1109_v25  ;;  %6228 = vmatmul.mubr.msk.f32.gmra.mrb[8].mxu1 %vm435_vm1, %v3120_v57  ;;  %v3122_v25 = vsel %vm8643_vm0, %v8641_v18, 0.0  ;;  %v7643_v57 = vld [vmem:[#allocation2 + $0x69] sm:$0xff]  ;;  %8644 = vst [vmem:[#allocation50_spill] sm:$0xff] %v7647_v30  ;;  %vm8666_vm0 = vnez %v8665_v63 }
 0x20c   : > { %6230 = vmatprep.mubr.msk.f32.mxu1 %vm435_vm1, %v7627_v45  ;;  %v8667_v18 = vld [vmem:[#allocation3_spill] sm:$0xff] }
 0x20e   : > { %6058 = vmatmul.mubr.msk.f32.gmra.mrb[28].mxu0 %vm435_vm1, %v7631_v55  ;;  %v1113_v55 = vsel %vm8647_vm7, %v8645_v17, 0.0  ;;  %v1793_v17 = vld [vmem:[#allocation2 + $0x11] sm:$0xff] }
 0x20f   : > { %6060 = vmatprep.mubr.msk.f32.mxu0 %vm435_vm1, %v1111_v11  ;;  %6231 = vmatmul.mubr.msk.f32.gmra.mrb[10].mxu1 %vm435_vm1, %v3122_v25  ;;  %v3124_v11 = vsel %vm7350_vm15, %v8648_v13, 0.0  ;;  %v7659_v25 = vld [vmem:[#allocation2 + $0x79] sm:$0xff] }
 0x210   : > { %6233 = vmatprep.mubr.msk.f32.mxu1 %vm435_vm1, %v7643_v57 }
 0x212   : > { %6061 = vmatmul.mubr.msk.f32.gmra.mrb[30].mxu0 %vm435_vm1, %v7647_v30 }
 0x213   : > { %6063 = vmatprep.mubr.msk.f32.mxu0 %vm435_vm1, %v1113_v55  ;;  %6234 = vmatmul.mubr.msk.f32.gmra.mrb[12].mxu1 %vm435_vm1, %v3124_v11  ;;  %v7671_v55 = vld [vmem:[#allocation2 + $0x89] sm:$0xff]  ;;  %v1889_v11 = vsel %vm7058_vm10, %v1793_v17, 0.0  ;;  %v8652_v17 = vld [vmem:[#allocation5_spill] sm:$0xff] }
 0x214   : > { %6236 = vmatprep.mubr.msk.f32.mxu1 %vm435_vm1, %v7659_v25 }
 0x216   : > { %6064 = vmatmul.mubr.msk.f32.gmra.mrb[32].mxu0 %vm435_vm1, %v7663_v34  ;;  %v8650_v34 = vld [vmem:[#allocation4_spill] sm:$0xff] }
 0x217   : > { %6237 = vmatmul.mubr.msk.f32.gmra.mrb[14].mxu1 %vm435_vm1, %v3126_v12  ;;  %6068 = vmatprep.mubr.msk.f32.mxu0 %vm435_vm1, %v1792_v24  ;;  %vm8651_vm7 = vnez %v8650_v34  ;;  %v7685_v12 = vld [vmem:[#allocation2 + $0x99] sm:$0xff]  ;;  %v1891_v24 = vsel %vm8626_vm4, %v7556_v44, 0.0  ;;  %v8655_v44 = vld [vmem:[#allocation10_spill] sm:$0xff] }
 0x218   : > { %6239 = vmatprep.mubr.msk.f32.mxu1 %vm435_vm1, %v7671_v55  ;;  %v3128_v30 = vsel %vm8651_vm7, %v7391_v36, 0.0 }
 0x21a   : > { %6069 = vmatmul.mubr.msk.f32.vlgmr.msra.gmra.mrb[2].mxu0 %vm435_vm1, %v1889_v11  ;;  %v8653_v11 = vld [vmem:[#allocation9_spill] sm:$0xff] }
 0x21b   : > { %6071 = vmatprep.mubr.msk.f32.mxu0 %vm435_vm1, %v7554_v49  ;;  %6240 = vmatmul.mubr.msk.f32.gmra.mrb[16].mxu1 %vm435_vm1, %v3128_v30  ;;  %vm8654_vm10 = vnez %v8653_v11  ;;  %v7700_v49 = vld [vmem:[#allocation2 + $0xa9] sm:$0xff]  ;;  %v8656_v30 = vld [vmem:[#allocation16_spill] sm:$0xff] }
 0x21c   : > { %6242 = vmatprep.mubr.msk.f32.mxu1 %vm435_vm1, %v7685_v12  ;;  %6117 = vmatpush3.msra.mxu0 %v6921_v26  ;;  %v3130_v35 = vsel %vm8654_vm10, %v8652_v17, 0.0  ;;  %v1893_v26 = vsel %vm8630_vm3, %v7032_v21, 0.0  ;;  %vm8657_vm4 = vnez %v8656_v30  ;;  %vm8660_vm3 = vnez %v8659_v5  ;;  %v4336_v11 = vld [vmem:[#allocation2 + $0x119] sm:$0xff] }
 0x21e   : > { %6072 = vmatmul.mubr.msk.f32.gmra.mrb[4].mxu0 %vm435_vm1, %v1891_v24  ;;  %v3132_v24 = vsel %vm8657_vm4, %v8655_v44, 0.0 }
 0x21f   : > { %6074 = vmatprep.mubr.msk.f32.mxu0 %vm435_vm1, %v7577_v22  ;;  %6243 = vmatmul.mubr.msk.f32.gmra.mrb[18].mxu1 %vm435_vm1, %v3130_v35  ;;  %v7714_v35 = vld [vmem:[#allocation2 + $0xb9] sm:$0xff] }
 0x220   : > { %6245 = vmatprep.mubr.msk.f32.mxu1 %vm435_vm1, %v7700_v49  ;;  %v8669_v22 = vld [vmem:[#allocation37_spill] sm:$0xff] }
 0x221   : > { %vm8670_vm15 = vnez %v8669_v22 }
 0x222   : > { %6075 = vmatmul.mubr.msk.f32.gmra.mrb[6].mxu0 %vm435_vm1, %v1893_v26  ;;  %v8658_v26 = vld [vmem:[#allocation17_spill] sm:$0xff] }
 0x223   : > { %6077 = vmatprep.mubr.msk.f32.mxu0 %vm435_vm1, %v7595_v41  ;;  %6246 = vmatmul.mubr.msk.f32.gmra.mrb[20].mxu1 %vm435_vm1, %v3132_v24  ;;  %v3134_v21 = vsel %vm8660_vm3, %v8658_v26, 0.0  ;;  %v7728_v24 = vld [vmem:[#allocation2 + $0xc9] sm:$0xff] }
 0x224   : > { %6248 = vmatprep.mubr.msk.f32.mxu1 %vm435_vm1, %v7714_v35 }
 0x226   : > { %6078 = vmatmul.mubr.msk.f32.gmra.mrb[8].mxu0 %vm435_vm1, %v1895_v40  ;;  %v8661_v40 = vld [vmem:[#allocation22_spill] sm:$0xff] }
 0x227   : > { %6080 = vmatprep.mubr.msk.f32.mxu0 %vm435_vm1, %v7611_v47  ;;  %6249 = vmatmul.mubr.msk.f32.gmra.mrb[22].mxu1 %vm435_vm1, %v3134_v21  ;;  %v3136_v41 = vsel %vm8663_vm8, %v8661_v40, 0.0  ;;  %v7742_v21 = vld [vmem:[#allocation2 + $0xd9] sm:$0xff] }
 0x228   : > { %6251 = vmatprep.mubr.msk.f32.mxu1 %vm435_vm1, %v7728_v24 }
 0x22a   : > { %6081 = vmatmul.mubr.msk.f32.gmra.mrb[10].mxu0 %vm435_vm1, %v1897_v8  ;;  %v8664_v8 = vld [vmem:[#allocation29_spill] sm:$0xff] }
 0x22b   : > { %6083 = vmatprep.mubr.msk.f32.mxu0 %vm435_vm1, %v7627_v45  ;;  %6252 = vmatmul.mubr.msk.f32.gmra.mrb[24].mxu1 %vm435_vm1, %v3136_v41  ;;  %v3138_v47 = vsel %vm8666_vm0, %v8664_v8, 0.0  ;;  %v7756_v41 = vld [vmem:[#allocation2 + $0xe9] sm:$0xff] }
 0x22c   : > { %6254 = vmatprep.mubr.msk.f32.mxu1 %vm435_vm1, %v7742_v21  ;;  %v8668_v45 = vld [vmem:[#allocation34_spill] sm:$0xff] }
 0x22d   : > { %v3140_v28 = vsel %vm8670_vm15, %v8668_v45, 0.0  ;;  %v8767_v5 = vsel %vm8666_vm0, %v8668_v45, 0.0 }
 0x22e   : > { %6084 = vmatmul.mubr.msk.f32.gmra.mrb[12].mxu0 %vm435_vm1, %v1899_v4  ;;  %v538_v4 = vadd.s32 248, %v8667_v18  ;;  %v1903_v18 = vsel %vm8651_vm7, %v7330_v61, 0.0 }
 0x22f   : > { %6086 = vmatprep.mubr.msk.f32.mxu0 %vm435_vm1, %v7643_v57  ;;  %6255 = vmatmul.mubr.msk.f32.gmra.mrb[26].mxu1 %vm435_vm1, %v3138_v47  ;;  %v7771_v47 = vld [vmem:[#allocation2 + $0xf9] sm:$0xff] }
 0x230   : > { %6257 = vmatprep.mubr.msk.f32.mxu1 %vm435_vm1, %v7756_v41  ;;  %v760_v52 = vand.u32 15, %v538_v4  ;;  %v1905_v4 = vsel %vm8654_vm10, %v7391_v36, 0.0 }
 0x232   : > { %6087 = vmatmul.mubr.msk.f32.gmra.mrb[14].mxu0 %vm435_vm1, %v1901_v7  ;;  %v8671_v7 = vld [vmem:[#allocation38_spill] sm:$0xff]  ;;  %vm7792_vm7 = vcmp.le.s32.totalorder %v760_v52, 14  ;;  %v1907_v52 = vsel %vm8657_vm4, %v8652_v17, 0.0 }
 0x233   : > { %6089 = vmatprep.mubr.msk.f32.mxu0 %vm435_vm1, %v7659_v25  ;;  %6258 = vmatmul.mubr.msk.f32.gmra.mrb[28].mxu1 %vm435_vm1, %v3140_v28  ;;  %v3142_v13 = vsel %vm7398_vm11, %v8671_v7, 0.0  ;;  %v7785_v28 = vld [vmem:[#allocation2 + $0x109] sm:$0xff]  ;;  %v3144_v34 = vsel %vm7792_vm7, %v7393_v23, 0.0 }
 0x234   : > { %6260 = vmatprep.mubr.msk.f32.mxu1 %vm435_vm1, %v7771_v47 }
 0x236   : > { %6090 = vmatmul.mubr.msk.f32.gmra.mrb[16].mxu0 %vm435_vm1, %v1903_v18 }
 0x237   : > { %6092 = vmatprep.mubr.msk.f32.mxu0 %vm435_vm1, %v7671_v55  ;;  %6261 = vmatmul.mubr.msk.f32.gmra.mrb[30].mxu1 %vm435_vm1, %v3142_v13  ;;  %v8674_v13 = vsel %vm6950_vm2, %v6977_v58, 0.0  ;;  %v8690_v58 = vld [vmem:[#allocation8_spill] sm:$0xff] }
 0x238   : > { %6263 = vmatprep.mubr.msk.f32.mxu1 %vm435_vm1, %v7785_v28 }
 0x23a   : > { %6093 = vmatmul.mubr.msk.f32.gmra.mrb[18].mxu0 %vm435_vm1, %v1905_v4  ;;  %v7815_v4 = vld [vmem:[%s8378_s3 + $0x40] sm:$0xff] }
 0x23b   : > { %6095 = vmatprep.mubr.msk.f32.mxu0 %vm435_vm1, %v7685_v12  ;;  %6264 = vmatmul.mubr.msk.f32.gmra.mrb[0].mxu1 %vm435_vm1, %v3144_v34  ;;  %v8675_v34 = vsel %vm7001_vm6, %v7030_v20, 0.0  ;;  %vm8689_vm6 = vnez %v8528_v60  ;;  %v8693_v20 = vld [vmem:[#allocation45_spill] sm:$0xff]  ;;  %v3921_v60 = vld [vmem:[#allocation2 + $0x38] sm:$0xff] }
 0x23c   : > { %6268 = vmatprep.mubr.msk.f32.mxu1 %vm435_vm1, %v8674_v13  ;;  %v1909_v13 = vsel %vm8660_vm3, %v8655_v44, 0.0 }
 0x23e   : > { %6096 = vmatmul.mubr.msk.f32.gmra.mrb[20].mxu0 %vm435_vm1, %v1907_v52  ;;  %v1911_v52 = vsel %vm8663_vm8, %v8658_v26, 0.0 }
 0x23f   : > { %6098 = vmatprep.mubr.msk.f32.mxu0 %vm435_vm1, %v7700_v49  ;;  %6269 = vmatmul.mubr.msk.f32.vlgmr.msra.gmra.mrb[2].mxu1 %vm435_vm1, %v7479_v53 }
 0x240   : > { %6317 = vmatpush3.msra.mxu1 %v7573_v29  ;;  %6271 = vmatprep.mubr.msk.f32.mxu1 %vm435_vm1, %v8675_v34  ;;  %v8676_v29 = vsel %vm7053_vm9, %v7088_v56, 0.0  ;;  %v8677_v34 = vsel %vm7114_vm14, %v7152_v43, 0.0  ;;  %v8699_v56 = vld [vmem:[#allocation47_spill] sm:$0xff]  ;;  %v8705_v43 = vld [vmem:[#allocation49_spill] sm:$0xff] }
 0x241   : > { %6366 = vmatprep.subr.mxu1 %v7815_v4 }
 0x242   : > { %6099 = vmatmul.mubr.msk.f32.gmra.mrb[22].mxu0 %vm435_vm1, %v1909_v13  ;;  %v1913_v13 = vsel %vm8666_vm0, %v8661_v40, 0.0 }
 0x243   : > { %6101 = vmatprep.mubr.msk.f32.mxu0 %vm435_vm1, %v7714_v35  ;;  %6272 = vmatmul.mubr.msk.f32.gmra.mrb[4].mxu1 %vm435_vm1, %v7489_v14 }
 0x244   : > { %6274 = vmatprep.mubr.msk.f32.mxu1 %vm435_vm1, %v8676_v29  ;;  %v8678_v29 = vsel %vm7175_vm13, %v7210_v9, 0.0  ;;  %v8711_v9 = vld [vmem:[#allocation50_spill] sm:$0xff] }
 0x246   : > { %6102 = vmatmul.mubr.msk.f32.gmra.mrb[24].mxu0 %vm435_vm1, %v1911_v52  ;;  %v1915_v52 = vsel %vm8670_vm15, %v8664_v8, 0.0  ;;  %vm8680_vm15 = vnez %v8601_v33 }
 0x247   : > { %6104 = vmatprep.mubr.msk.f32.mxu0 %vm435_vm1, %v7728_v24  ;;  %6275 = vmatmul.mubr.msk.f32.gmra.mrb[6].mxu1 %vm435_vm1, %v7499_v54  ;;  %v8710_v1 = vsel %vm8680_vm15, %v7268_v2, 0.0 }
 0x248   : > { %6277 = vmatprep.mubr.msk.f32.mxu1 %vm435_vm1, %v8677_v34  ;;  %v8679_v34 = vsel %vm7236_vm12, %v7268_v2, 0.0  ;;  %v8717_v2 = vld [vmem:[#allocation51_spill] sm:$0xff] }
 0x24a   : > { %6105 = vmatmul.mubr.msk.f32.gmra.mrb[26].mxu0 %vm435_vm1, %v1913_v13  ;;  %v1917_v13 = vsel %vm7398_vm11, %v8668_v45, 0.0  ;;  %vm8683_vm11 = vnez %v8613_v46 }
 0x24b   : > { %6107 = vmatprep.mubr.msk.f32.mxu0 %vm435_vm1, %v7742_v21  ;;  %6278 = vmatmul.mubr.msk.f32.gmra.mrb[8].mxu1 %vm435_vm1, %v7509_v27  ;;  %v8716_v33 = vsel %vm8683_vm11, %v7328_v48, 0.0 }
 0x24c   : > { %6280 = vmatprep.mubr.msk.f32.mxu1 %vm435_vm1, %v8678_v29  ;;  %v8681_v29 = vsel %vm8680_vm15, %v7328_v48, 0.0  ;;  %v8721_v48 = vld [vmem:[#allocation36_spill] sm:$0xff] }
 0x24e   : > { %6108 = vmatmul.mubr.msk.f32.gmra.mrb[28].mxu0 %vm435_vm1, %v1915_v52  ;;  %v1919_v52 = vsel %vm7792_vm7, %v8671_v7, 0.0 }
 0x24f   : > { %6110 = vmatprep.mubr.msk.f32.mxu0 %vm435_vm1, %v7756_v41  ;;  %6281 = vmatmul.mubr.msk.f32.gmra.mrb[10].mxu1 %vm435_vm1, %v7519_v31 }
 0x250   : > { %6283 = vmatprep.mubr.msk.f32.mxu1 %vm435_vm1, %v8679_v34  ;;  %v8682_v34 = vsel %vm6950_vm2, %v6956_v42, 0.0  ;;  %vm8686_vm2 = vnez %v8526_v59  ;;  %v3919_v59 = vld [vmem:[#allocation2 + $0x28] sm:$0xff] }
 0x251   : > { %v8687_v42 = vsel %vm8686_vm2, %v6995_v0, 0.0  ;;  %v8720_v46 = vsel %vm8686_vm2, %v7369_v51, 0.0 }
 0x252   : > { %6111 = vmatmul.mubr.msk.f32.gmra.mrb[30].mxu0 %vm435_vm1, %v1917_v13  ;;  %v8684_v13 = vsel %vm8683_vm11, %v7369_v51, 0.0  ;;  %vm8722_vm11 = vnez %v8721_v48  ;;  %v3920_v51 = vld [vmem:[#allocation2 + $0x30] sm:$0xff]  ;;  %v3945_v48 = vld [vmem:[#allocation2 + $0xf8] sm:$0xff] }
 0x253   : > { %6113 = vmatprep.mubr.msk.f32.mxu0 %vm435_vm1, %v7771_v47  ;;  %6284 = vmatmul.mubr.msk.f32.gmra.mrb[12].mxu1 %vm435_vm1, %v7529_v50 }
 0x254   : > { %6286 = vmatprep.mubr.msk.f32.mxu1 %vm435_vm1, %v8681_v29  ;;  %v8696_v29 = vld [vmem:[#allocation15_spill] sm:$0xff] }
 0x256   : > { %6114 = vmatmul.mubr.msk.f32.gmra.mrb[32].mxu0 %vm435_vm1, %v1919_v52 }
 0x257   : > { %6118 = vmatprep.mubr.msk.f32.mxu0 %vm435_vm1, %v8682_v34  ;;  %6287 = vmatmul.mubr.msk.f32.gmra.mrb[14].mxu1 %vm435_vm1, %v7542_v19  ;;  %v8702_v34 = vld [vmem:[#allocation21_spill] sm:$0xff] }
 0x258   : > { %6289 = vmatprep.mubr.msk.f32.mxu1 %vm435_vm1, %v8684_v13 }
 0x25a   : > { %6119 = vmatmul.mubr.msk.f32.vlgmr.msra.gmra.mrb[2].mxu0 %vm435_vm1, %v7468_v15  ;;  %v8691_v15 = vsel %vm8689_vm6, %v8690_v58, 0.0 }
 0x25b   : > { %6121 = vmatprep.mubr.msk.f32.mxu0 %vm435_vm1, %v8685_v39  ;;  %6290 = vmatmul.mubr.msk.f32.gmra.mrb[16].mxu1 %vm435_vm1, %v7560_v38  ;;  %v8708_v39 = vld [vmem:[#allocation27_spill] sm:$0xff] }
 0x25c   : > { %6292 = vmatprep.mubr.msk.f32.mxu1 %vm435_vm1, %v8687_v42 }
 0x25e   : > { %6122 = vmatmul.mubr.msk.f32.gmra.mrb[4].mxu0 %vm435_vm1, %v7479_v53  ;;  %v8694_v53 = vld [vmem:[#allocation7_spill] sm:$0xff] }
 0x25f   : > { %6124 = vmatprep.mubr.msk.f32.mxu0 %vm435_vm1, %v8688_v3  ;;  %6293 = vmatmul.mubr.msk.f32.gmra.mrb[18].mxu1 %vm435_vm1, %v7582_v37  ;;  %vm8695_vm9 = vnez %v8694_v53  ;;  %v8714_v3 = vld [vmem:[#allocation33_spill] sm:$0xff] }
 0x260   : > { %6295 = vmatprep.mubr.msk.f32.mxu1 %vm435_vm1, %v8691_v15  ;;  %v8697_v52 = vsel %vm8695_vm9, %v8696_v29, 0.0  ;;  %v3926_v53 = vld [vmem:[#allocation2 + $0x60] sm:$0xff] }
 0x262   : > { %6125 = vmatmul.mubr.msk.f32.gmra.mrb[6].mxu0 %vm435_vm1, %v7489_v14  ;;  %v8700_v14 = vld [vmem:[#allocation13_spill] sm:$0xff] }
 0x263   : > { %6127 = vmatprep.mubr.msk.f32.mxu0 %vm435_vm1, %v8692_v32  ;;  %6296 = vmatmul.mubr.msk.f32.gmra.mrb[20].mxu1 %vm435_vm1, %v8693_v20  ;;  %vm8701_vm14 = vnez %v8700_v14  ;;  %v3528_v32 = vld [vmem:[#allocation2 + $0x107] sm:$0xff]  ;;  %v3928_v14 = vld [vmem:[#allocation2 + $0x70] sm:$0xff] }
 0x264   : > { %6298 = vmatprep.mubr.msk.f32.mxu1 %vm435_vm1, %v8697_v52  ;;  %v8703_v13 = vsel %vm8701_vm14, %v8702_v34, 0.0 }
 0x266   : > { %6128 = vmatmul.mubr.msk.f32.gmra.mrb[8].mxu0 %vm435_vm1, %v7499_v54  ;;  %v8706_v54 = vld [vmem:[#allocation20_spill] sm:$0xff] }
 0x267   : > { %6130 = vmatprep.mubr.msk.f32.mxu0 %vm435_vm1, %v8698_v16  ;;  %6299 = vmatmul.mubr.msk.f32.gmra.mrb[22].mxu1 %vm435_vm1, %v8699_v56  ;;  %vm8707_vm13 = vnez %v8706_v54  ;;  %v3530_v16 = vld [vmem:[#allocation2 + $0x117] sm:$0xff]  ;;  %v3930_v54 = vld [vmem:[#allocation2 + $0x80] sm:$0xff] }
 0x268   : > { %6301 = vmatprep.mubr.msk.f32.mxu1 %vm435_vm1, %v8703_v13  ;;  %v8709_v42 = vsel %vm8707_vm13, %v8708_v39, 0.0  ;;  %v3529_v13 = vld [vmem:[#allocation2 + $0x10f] sm:$0xff] }
 0x26a   : > { %6131 = vmatmul.mubr.msk.f32.gmra.mrb[10].mxu0 %vm435_vm1, %v7509_v27  ;;  %v8712_v27 = vld [vmem:[#allocation25_spill] sm:$0xff] }
 0x26b   : > { %6133 = vmatprep.mubr.msk.f32.mxu0 %vm435_vm1, %v8704_v10  ;;  %6302 = vmatmul.mubr.msk.f32.gmra.mrb[24].mxu1 %vm435_vm1, %v8705_v43  ;;  %vm8713_vm12 = vnez %v8712_v27  ;;  %v3531_v10 = vld [vmem:[#allocation2 + $0x11f] sm:$0xff] }
 0x26c   : > { %6304 = vmatprep.mubr.msk.f32.mxu1 %vm435_vm1, %v8709_v42  ;;  %v8715_v15 = vsel %vm8713_vm12, %v8714_v3, 0.0  ;;  %v8724_v42 = vsel %vm8695_vm9, %v8690_v58, 0.0  ;;  %v8726_v58 = vsel %vm8707_vm13, %v8702_v34, 0.0  ;;  %v3934_v27 = vld [vmem:[#allocation2 + $0xa0] sm:$0xff] }
 0x26e   : > { %6134 = vmatmul.mubr.msk.f32.gmra.mrb[12].mxu0 %vm435_vm1, %v7519_v31  ;;  %v8718_v31 = vld [vmem:[#allocation32_spill] sm:$0xff] }
 0x26f   : > { %6136 = vmatprep.mubr.msk.f32.mxu0 %vm435_vm1, %v8710_v1  ;;  %6305 = vmatmul.mubr.msk.f32.gmra.mrb[26].mxu1 %vm435_vm1, %v8711_v9  ;;  %vm8719_vm15 = vnez %v8718_v31  ;;  %v3932_v1 = vld [vmem:[#allocation2 + $0x90] sm:$0xff] }
 0x270   : > { %6307 = vmatprep.mubr.msk.f32.mxu1 %vm435_vm1, %v8715_v15  ;;  %v3560_v52 = vsel %vm8719_vm15, %v3528_v32, 0.0  ;;  %v8728_v34 = vsel %vm8719_vm15, %v8714_v3, 0.0  ;;  %v3935_v3 = vld [vmem:[#allocation2 + $0xa8] sm:$0xff]  ;;  %v3936_v15 = vld [vmem:[#allocation2 + $0xb0] sm:$0xff]  ;;  %v3937_v32 = vld [vmem:[#allocation2 + $0xb8] sm:$0xff] }
 0x271   : > { %v3940_v31 = vld [vmem:[#allocation2 + $0xd0] sm:$0xff] }
 0x272   : > { %6137 = vmatmul.mubr.msk.f32.gmra.mrb[14].mxu0 %vm435_vm1, %v7529_v50  ;;  %v3562_v50 = vsel %vm8722_vm11, %v3530_v16, 0.0  ;;  %v3942_v16 = vld [vmem:[#allocation2 + $0xe0] sm:$0xff] }
 0x273   : > { %6139 = vmatprep.mubr.msk.f32.mxu0 %vm435_vm1, %v8716_v33  ;;  %6308 = vmatmul.mubr.msk.f32.gmra.mrb[28].mxu1 %vm435_vm1, %v8717_v2  ;;  %v3938_v33 = vld [vmem:[#allocation2 + $0xc0] sm:$0xff] }
 0x274   : > { %6310 = vmatprep.mubr.msk.f32.mxu1 %vm435_vm1, %v3560_v52  ;;  %v3941_v52 = vld [vmem:[#allocation2 + $0xd8] sm:$0xff] }
 0x276   : > { %6140 = vmatmul.mubr.msk.f32.gmra.mrb[16].mxu0 %vm435_vm1, %v7542_v19  ;;  %v8723_v19 = vsel %vm8689_vm6, %v6995_v0, 0.0  ;;  %v3922_v0 = vld [vmem:[#allocation2 + $0x40] sm:$0xff] }
 0x277   : > { %6142 = vmatprep.mubr.msk.f32.mxu0 %vm435_vm1, %v8720_v46  ;;  %6311 = vmatmul.mubr.msk.f32.gmra.mrb[30].mxu1 %vm435_vm1, %v3529_v13  ;;  %v3943_v13 = vld [vmem:[#allocation2 + $0xe8] sm:$0xff]  ;;  %v3944_v46 = vld [vmem:[#allocation2 + $0xf0] sm:$0xff] }
 0x278   : > { %6313 = vmatprep.mubr.msk.f32.mxu1 %vm435_vm1, %v3562_v50  ;;  %v3946_v50 = vld [vmem:[#allocation2 + $0x100] sm:$0xff] }
 0x27a   : > { %6143 = vmatmul.mubr.msk.f32.gmra.mrb[18].mxu0 %vm435_vm1, %v7560_v38  ;;  %v8725_v38 = vsel %vm8701_vm14, %v8696_v29, 0.0  ;;  %v8727_v29 = vsel %vm8713_vm12, %v8708_v39, 0.0  ;;  %v3931_v39 = vld [vmem:[#allocation2 + $0x88] sm:$0xff] }
 0x27b   : > { %6145 = vmatprep.mubr.msk.f32.mxu0 %vm435_vm1, %v8723_v19  ;;  %6314 = vmatmul.mubr.msk.f32.gmra.mrb[0].mxu1 %vm435_vm1, %v3531_v10  ;;  %v8729_v10 = vld [vmem:[#allocation41_spill] sm:$0xff]  ;;  %v3949_v19 = vld [vmem:[#allocation2 + $0x118] sm:$0xff] }
 0x27c   : > { %6318 = vmatprep.mubr.msk.f32.mxu1 %vm435_vm1, %v3919_v59  ;;  %v8730_v59 = vld [vmem:[#allocation42_spill] sm:$0xff] }
 0x27e   : > { %6146 = vmatmul.mubr.msk.f32.gmra.mrb[20].mxu0 %vm435_vm1, %v7582_v37  ;;  %v3923_v37 = vld [vmem:[#allocation2 + $0x48] sm:$0xff] }
 0x27f   : > { %6148 = vmatprep.mubr.msk.f32.mxu0 %vm435_vm1, %v8724_v42  ;;  %6319 = vmatmul.mubr.msk.f32.vlgmr.msra.gmra.mrb[2].mxu1 %vm435_vm1, %v3920_v51  ;;  %v3950_v51 = vld [vmem:[#allocation2 + $0x120] sm:$0xff]  ;;  %v8731_v42 = vld [vmem:[#allocation43_spill] sm:$0xff] }
 0x280   : > { %6367 = vmatpush3.msra.mxu1 %v7815_v4  ;;  %6321 = vmatprep.mubr.msk.f32.mxu1 %vm435_vm1, %v3921_v60  ;;  %v3924_v4 = vld [vmem:[#allocation2 + $0x50] sm:$0xff] }
 0x281   : > { %v8732_v60 = vld [vmem:[#allocation11_spill] sm:$0xff] }
 0x282   : > { %6149 = vmatmul.mubr.msk.f32.gmra.mrb[22].mxu0 %vm435_vm1, %v8693_v20  ;;  %v3925_v20 = vld [vmem:[#allocation2 + $0x58] sm:$0xff]  ;;  %vm8733_vm2 = vnez %v8732_v60 }
 0x283   : > { %6151 = vmatprep.mubr.msk.f32.mxu0 %vm435_vm1, %v8725_v38  ;;  %6322 = vmatmul.mubr.msk.f32.gmra.mrb[4].mxu1 %vm435_vm1, %v3922_v0  ;;  %v8734_v0 = vld [vmem:[#allocation6_spill] sm:$0xff] }
 0x284   : > { %6324 = vmatprep.mubr.msk.f32.mxu1 %vm435_vm1, %v3923_v37  ;;  %v8735_v38 = vsel %vm8733_vm2, %v8734_v0, 0.0  ;;  %v8736_v37 = vld [vmem:[#allocation44_spill] sm:$0xff] }
 0x286   : > { %6152 = vmatmul.mubr.msk.f32.gmra.mrb[24].mxu0 %vm435_vm1, %v8699_v56  ;;  %v3927_v56 = vld [vmem:[#allocation2 + $0x68] sm:$0xff] }
 0x287   : > { %6154 = vmatprep.mubr.msk.f32.mxu0 %vm435_vm1, %v8726_v58  ;;  %6325 = vmatmul.mubr.msk.f32.gmra.mrb[6].mxu1 %vm435_vm1, %v3924_v4  ;;  %v8737_v4 = vld [vmem:[#allocation14_spill] sm:$0xff]  ;;  %v8739_v58 = vld [vmem:[#allocation12_spill] sm:$0xff] }
 0x288   : > { %6327 = vmatprep.mubr.msk.f32.mxu1 %vm435_vm1, %v3925_v20  ;;  %vm8738_vm6 = vnez %v8737_v4 }
 0x289   : > { %v8740_v20 = vsel %vm8738_vm6, %v8739_v58, 0.0  ;;  %v8260_v58 = vld [vmem:[%s8379_s4] ss:$0 sm:$0xff] }
 0x28a   : > { %6155 = vmatmul.mubr.msk.f32.gmra.mrb[26].mxu0 %vm435_vm1, %v8705_v43  ;;  %v3929_v43 = vld [vmem:[#allocation2 + $0x78] sm:$0xff] }
 0x28b   : > { %6157 = vmatprep.mubr.msk.f32.mxu0 %vm435_vm1, %v8727_v29  ;;  %6328 = vmatmul.mubr.msk.f32.gmra.mrb[8].mxu1 %vm435_vm1, %v3926_v53  ;;  %v8741_v53 = vld [vmem:[#allocation46_spill] sm:$0xff]  ;;  %v8742_v29 = vld [vmem:[#allocation23_spill] sm:$0xff] }
 0x28c   : > { %6330 = vmatprep.mubr.msk.f32.mxu1 %vm435_vm1, %v3927_v56  ;;  %vm8743_vm9 = vnez %v8742_v29  ;;  %v8744_v56 = vld [vmem:[#allocation18_spill] sm:$0xff] }
 0x28e   : > { %6158 = vmatmul.mubr.msk.f32.gmra.mrb[28].mxu0 %vm435_vm1, %v8711_v9  ;;  %v3933_v9 = vld [vmem:[#allocation2 + $0x98] sm:$0xff] }
 0x28f   : > { %6160 = vmatprep.mubr.msk.f32.mxu0 %vm435_vm1, %v8728_v34  ;;  %6331 = vmatmul.mubr.msk.f32.gmra.mrb[10].mxu1 %vm435_vm1, %v3928_v14  ;;  %v8745_v14 = vsel %vm8743_vm9, %v8744_v56, 0.0  ;;  %v8746_v34 = vld [vmem:[#allocation48_spill] sm:$0xff] }
 0x290   : > { %6333 = vmatprep.mubr.msk.f32.mxu1 %vm435_vm1, %v3929_v43  ;;  %v8747_v43 = vld [vmem:[#allocation26_spill] sm:$0xff] }
 0x291   : > { %vm8748_vm14 = vnez %v8747_v43 }
 0x292   : > { %6161 = vmatmul.mubr.msk.f32.gmra.mrb[30].mxu0 %vm435_vm1, %v8717_v2  ;;  %v3939_v2 = vld [vmem:[#allocation2 + $0xc8] sm:$0xff] }
 0x293   : > { %6334 = vmatmul.mubr.msk.f32.gmra.mrb[12].mxu1 %vm435_vm1, %v3930_v54  ;;  %v8749_v54 = vld [vmem:[#allocation24_spill] sm:$0xff] }
 0x294   : > { %6336 = vmatprep.mubr.msk.f32.mxu1 %vm435_vm1, %v3931_v39  ;;  %v8750_v39 = vsel %vm8748_vm14, %v8749_v54, 0.0 }
 0x297   : > { %6337 = vmatmul.mubr.msk.f32.gmra.mrb[14].mxu1 %vm435_vm1, %v3932_v1  ;;  %v8751_v1 = vld [vmem:[#allocation35_spill] sm:$0xff] }
 0x298   : > { %6339 = vmatprep.mubr.msk.f32.mxu1 %vm435_vm1, %v3933_v9  ;;  %vm8752_vm13 = vnez %v8751_v1  ;;  %v8753_v9 = vld [vmem:[#allocation30_spill] sm:$0xff] }
 0x29b   : > { %6340 = vmatmul.mubr.msk.f32.gmra.mrb[16].mxu1 %vm435_vm1, %v3934_v27  ;;  %v8754_v27 = vsel %vm8752_vm13, %v8753_v9, 0.0 }
 0x29c   : > { %6342 = vmatprep.mubr.msk.f32.mxu1 %vm435_vm1, %v3935_v3  ;;  %v8755_v3 = vld [vmem:[#allocation39_spill] sm:$0xff] }
 0x29d   : > { %vm8756_vm12 = vnez %v8755_v3 }
 0x29f   : > { %6343 = vmatmul.mubr.msk.f32.gmra.mrb[18].mxu1 %vm435_vm1, %v3936_v15  ;;  %v8757_v15 = vsel %vm8756_vm12, %v7330_v61, 0.0  ;;  %v4796_v61 = vld [vmem:[%s8380_s5] sm:$0xff] }
 0x2a0   : > { %6345 = vmatprep.mubr.msk.f32.mxu1 %vm435_vm1, %v3937_v32  ;;  %6416 = vmatprep.subr.mxu0 %v4796_v61 }
 0x2a1   : > { %6417 = vmatpush3.msra.mxu0 %v4796_v61 }
 0x2a3   : > { %6346 = vmatmul.mubr.msk.f32.gmra.mrb[20].mxu1 %vm435_vm1, %v3938_v33  ;;  %v8760_v33 = vld [vmem:[#allocation4_spill] sm:$0xff] }
 0x2a4   : > { %6348 = vmatprep.mubr.msk.f32.mxu1 %vm435_vm1, %v3939_v2  ;;  %vm8761_vm15 = vnez %v8760_v33 }
 0x2a7   : > { %6349 = vmatmul.mubr.msk.f32.gmra.mrb[22].mxu1 %vm435_vm1, %v3940_v31 }
 0x2a8   : > { %6351 = vmatprep.mubr.msk.f32.mxu1 %vm435_vm1, %v3941_v52 }
 0x2ab   : > { %6352 = vmatmul.mubr.msk.f32.gmra.mrb[24].mxu1 %vm435_vm1, %v3942_v16 }
 0x2ac   : > { %6354 = vmatprep.mubr.msk.f32.mxu1 %vm435_vm1, %v3943_v13 }
 0x2af   : > { %6355 = vmatmul.mubr.msk.f32.gmra.mrb[26].mxu1 %vm435_vm1, %v3944_v46 }
 0x2b0   : > { %6357 = vmatprep.mubr.msk.f32.mxu1 %vm435_vm1, %v3945_v48 }
 0x2b3   : > { %6358 = vmatmul.mubr.msk.f32.gmra.mrb[28].mxu1 %vm435_vm1, %v3946_v50 }
 0x2b4   : > { %6360 = vmatprep.mubr.msk.f32.mxu1 %vm435_vm1, %v8729_v10  ;;  %v5183_v10 = vld [vmem:[%s8381_s6 + $0x8] sm:$0xff] }
 0x2b5   : > { %5193 = vperm.xlu1 %6743, %v5183_v10  }
 0x2b7   : > { %6361 = vmatmul.mubr.msk.f32.gmra.mrb[30].mxu1 %vm435_vm1, %v8730_v59 }
 0x2b8   : > { %6363 = vmatprep.mubr.msk.f32.mxu1 %vm435_vm1, %v3949_v19 }
 0x2bb   : > { %6364 = vmatmul.mubr.msk.f32.gmra.mrb[0].mxu1 %vm435_vm1, %v3950_v51 }
 0x2bc   : > { %6368 = vmatprep.mubr.msk.f32.mxu1 %vm435_vm1, %v8731_v42 }
 0x2bf   : > { %6369 = vmatmul.mubr.msk.f32.vlgmr.msra.gmra.mrb[2].mxu1 %vm435_vm1, %v8735_v38 }
 0x2c0   : > { %6371 = vmatprep.mubr.msk.f32.mxu1 %vm435_vm1, %v8736_v37 }
 0x2c3   : > { %6372 = vmatmul.mubr.msk.f32.gmra.mrb[4].mxu1 %vm435_vm1, %v8740_v20 }
 0x2c4   : > { %6374 = vmatprep.mubr.msk.f32.mxu1 %vm435_vm1, %v8741_v53 }
 0x2c7   : > { %6375 = vmatmul.mubr.msk.f32.gmra.mrb[6].mxu1 %vm435_vm1, %v8745_v14 }
 0x2c8   : > { %6377 = vmatprep.mubr.msk.f32.mxu1 %vm435_vm1, %v8746_v34 }
 0x2cb   : > { %6378 = vmatmul.mubr.msk.f32.gmra.mrb[8].mxu1 %vm435_vm1, %v8750_v39 }
 0x2cc   : > { %6380 = vmatprep.mubr.msk.f32.mxu1 %vm435_vm1, %v7643_v57  ;;  %v8759_v57 = vsel %vm7378_vm5, %v7391_v36, 0.0  ;;  %v8763_v36 = vsel %vm8654_vm10, %v8655_v44, 0.0 }
 0x2cf   : > { %6381 = vmatmul.mubr.msk.f32.gmra.mrb[10].mxu1 %vm435_vm1, %v8754_v27 }
 0x2d0   : > { %6383 = vmatprep.mubr.msk.f32.mxu1 %vm435_vm1, %v7659_v25  ;;  %v8762_v25 = vsel %vm8761_vm15, %v8652_v17, 0.0  ;;  %v8766_v17 = vsel %vm8663_vm8, %v8664_v8, 0.0 }
 0x2d3   : > { %6384 = vmatmul.mubr.msk.f32.gmra.mrb[12].mxu1 %vm435_vm1, %v8757_v15 }
 0x2d4   : > { %6386 = vmatprep.mubr.msk.f32.mxu1 %vm435_vm1, %v7671_v55  ;;  %v8764_v55 = vsel %vm8657_vm4, %v8658_v26, 0.0  ;;  %vm8770_vm4 = vnez %v8621_v6 }
 0x2d5   : > { %v8771_v63 = vsel %vm8770_vm4, %v7393_v23, 0.0 }
 0x2d7   : > { %6387 = vmatmul.mubr.msk.f32.gmra.mrb[14].mxu1 %vm435_vm1, %v8759_v57 }
 0x2d8   : > { %6389 = vmatprep.mubr.msk.f32.mxu1 %vm435_vm1, %v7685_v12  ;;  %v8765_v12 = vsel %vm8660_vm3, %v8661_v40, 0.0  ;;  %vm8768_vm3 = vnez %v8669_v22 }
 0x2d9   : > { %v8769_v62 = vsel %vm8768_vm3, %v8671_v7, 0.0 }
 0x2db   : > { %6390 = vmatmul.mubr.msk.f32.gmra.mrb[16].mxu1 %vm435_vm1, %v8762_v25 }
 0x2dc   : > { %6392 = vmatprep.mubr.msk.f32.mxu1 %vm435_vm1, %v7700_v49  ;;  %v4337_v49 = vld [vmem:[#allocation2 + $0x121] sm:$0xff] }
 0x2dd   : > { %v4369_v22 = vsel %vm7792_vm7, %v4337_v49, 0.0 }
 0x2df   : > { %6393 = vmatmul.mubr.msk.f32.gmra.mrb[18].mxu1 %vm435_vm1, %v8763_v36 }
 0x2e0   : > { %6395 = vmatprep.mubr.msk.f32.mxu1 %vm435_vm1, %v7714_v35 }
 0x2e3   : > { %6396 = vmatmul.mubr.msk.f32.gmra.mrb[20].mxu1 %vm435_vm1, %v8764_v55 }
 0x2e4   : > { %6398 = vmatprep.mubr.msk.f32.mxu1 %vm435_vm1, %v7728_v24 }
 0x2e7   : > { %6399 = vmatmul.mubr.msk.f32.gmra.mrb[22].mxu1 %vm435_vm1, %v8765_v12 }
 0x2e8   : > { %6401 = vmatprep.mubr.msk.f32.mxu1 %vm435_vm1, %v7742_v21 }
 0x2eb   : > { %6402 = vmatmul.mubr.msk.f32.gmra.mrb[24].mxu1 %vm435_vm1, %v8766_v17 }
 0x2ec   : > { %6404 = vmatprep.mubr.msk.f32.mxu1 %vm435_vm1, %v7756_v41 }
 0x2ef   : > { %6405 = vmatmul.mubr.msk.f32.gmra.mrb[26].mxu1 %vm435_vm1, %v8767_v5 }
 0x2f0   : > { %6407 = vmatprep.mubr.msk.f32.mxu1 %vm435_vm1, %v7771_v47 }
 0x2f3   : > { %6408 = vmatmul.mubr.msk.f32.gmra.mrb[28].mxu1 %vm435_vm1, %v8769_v62 }
 0x2f4   : > { %6410 = vmatprep.mubr.msk.f32.mxu1 %vm435_vm1, %v7785_v28 }
 0x2f7   : > { %6411 = vmatmul.mubr.msk.f32.gmra.mrb[30].mxu1 %vm435_vm1, %v8771_v63 }
 0x2f8   : > { %6413 = vmatprep.mubr.msk.f32.mxu1 %vm435_vm1, %v4336_v11 }
 0x2fb   : > { %6414 = vmatmul.mubr.msk.f32.gmra.mrb[0].mxu1 %vm435_vm1, %v4369_v22 }
 0x329   : > { %v8208_v45 = vpop.f32.mrb[32].mxu0 }
 0x32a   : > { %v8210_v44 = vpop.f32.mrb[33].mxu0 }
 0x32d   : > { %v6120_v30 = vpop.f32.mrb[2].mxu0 }
 0x32e   : > { %v2503_v35 = vpop.f32.mrb[3].mxu0 }
 0x331   : > { %v6123_v26 = vpop.f32.mrb[4].mxu0 }
 0x332   : > { %v2513_v24 = vpop.f32.mrb[5].mxu0 }
 0x335   : > { %v6126_v6 = vpop.f32.mrb[6].mxu0 }
 0x336   : > { %v2523_v40 = vpop.f32.mrb[7].mxu0 }
 0x339   : > { %v6129_v23 = vpop.f32.mrb[8].mxu0 }
 0x33a   : > { %v2533_v21 = vpop.f32.mrb[9].mxu0 }
 0x33d   : > { %v6132_v8 = vpop.f32.mrb[10].mxu0 }
 0x33e   : > { %v8212_v41 = vpop.f32.mrb[11].mxu0 }
 0x341   : > { %v8214_v47 = vpop.f32.mrb[12].mxu0 }
 0x342   : > { %v8216_v7 = vpop.f32.mrb[13].mxu0 }
 0x345   : > { %v8218_v28 = vpop.f32.mrb[14].mxu0 }
 0x346   : > { %v8220_v18 = vpop.f32.mrb[15].mxu0 }
 0x349   : > { %v8222_v2 = vpop.f32.mrb[16].mxu0 }
 0x34a   : > { %v8224_v31 = vpop.f32.mrb[17].mxu0 }
 0x34d   : > { %v8226_v52 = vpop.f32.mrb[18].mxu0 }
 0x34e   : > { %v8228_v16 = vpop.f32.mrb[19].mxu0 }
 0x351   : > { %v8230_v13 = vpop.f32.mrb[20].mxu0 }
 0x352   : > { %v8232_v46 = vpop.f32.mrb[21].mxu0 }
 0x355   : > { %v8234_v48 = vpop.f32.mrb[22].mxu0 }
 0x356   : > { %v8236_v50 = vpop.f32.mrb[23].mxu0 }
 0x359   : > { %v8241_v19 = vpop.f32.mrb[24].mxu0 }
 0x35a   : > { %v8243_v59 = vpop.f32.mrb[25].mxu0 }
 0x35d   : > { %v8245_v51 = vpop.f32.mrb[26].mxu0 }
 0x35e   : > { %v8247_v42 = vpop.f32.mrb[27].mxu0 }
 0x361   : > { %v8249_v60 = vpop.f32.mrb[28].mxu0 }
 0x362   : > { %v8251_v0 = vpop.f32.mrb[29].mxu0 }
 0x365   : > { %v8253_v38 = vpop.f32.mrb[30].mxu0 }
 0x366   : > { %v8255_v37 = vpop.f32.mrb[31].mxu0 }
 0x392   : > { %v6370_v4 = vpop.f32.mrb[2].mxu1 }
 0x393   : > { %v6476_v20 = vadd.f32 %v6370_v4, %v6120_v30  ;;  %v4534_v53 = vpop.f32.mrb[3].mxu1 }
 0x394   : > { %v6477_v29 = vadd.f32 %v4534_v53, %v2503_v35 }
 0x395   : > { %v4733_v56 = vadd.f32 %v6476_v20, %v8260_v58 }
 0x396   : > { %v4732_v14 = vadd.f32 %v6477_v29, %v8260_v58  ;;  %v6373_v34 = vpop.f32.mrb[4].mxu1 }
 0x397   : > { %v6478_v43 = vadd.f32 %v6373_v34, %v6123_v26  ;;  %v4544_v54 = vpop.f32.mrb[5].mxu1  ;;  %v4765_v9 = vmax.f32 %v4733_v56, 0.0 }
 0x398   : > { %v4764_v39 = vmax.f32 %v4732_v14, 0.0  ;;  %v6479_v1 = vadd.f32 %v4544_v54, %v2513_v24 }
 0x399   : > { %v4735_v27 = vadd.f32 %v6478_v43, %v8260_v58 }
 0x39a   : > { %v4734_v3 = vadd.f32 %v6479_v1, %v8260_v58  ;;  %v6376_v15 = vpop.f32.mrb[6].mxu1  ;;  %6418 = vmatprep.mubr.msk.f32.mxu0 %vm435_vm1, %v4764_v39 }
 0x39b   : > { %v6480_v32 = vadd.f32 %v6376_v15, %v6126_v6  ;;  %v4554_v57 = vpop.f32.mrb[7].mxu1  ;;  %6419 = vmatmul.mubr.msk.f32.vlgmr.msra.gmra.mrb[34].mxu0 %vm435_vm1, %v4765_v9  ;;  %v4767_v61 = vmax.f32 %v4735_v27, 0.0 }
 0x39c   : > { %v4766_v33 = vmax.f32 %v4734_v3, 0.0  ;;  %v6481_v25 = vadd.f32 %v4554_v57, %v2523_v40 }
 0x39d   : > { %v4737_v36 = vadd.f32 %v6480_v32, %v8260_v58 }
 0x39e   : > { %v4736_v55 = vadd.f32 %v6481_v25, %v8260_v58  ;;  %v6379_v12 = vpop.f32.mrb[8].mxu1  ;;  %6421 = vmatprep.mubr.msk.f32.mxu0 %vm435_vm1, %v4766_v33 }
 0x39f   : > { %v6482_v17 = vadd.f32 %v6379_v12, %v6129_v23  ;;  %v4564_v5 = vpop.f32.mrb[9].mxu1  ;;  %6422 = vmatmul.mubr.msk.f32.gmra.mrb[36].mxu0 %vm435_vm1, %v4767_v61  ;;  %v4769_v49 = vmax.f32 %v4737_v36, 0.0 }
 0x3a0   : > { %v4768_v62 = vmax.f32 %v4736_v55, 0.0  ;;  %v6483_v11 = vadd.f32 %v4564_v5, %v2533_v21 }
 0x3a1   : > { %v4739_v63 = vadd.f32 %v6482_v17, %v8260_v58 }
 0x3a2   : > { %v4738_v22 = vadd.f32 %v6483_v11, %v8260_v58  ;;  %v6382_v30 = vpop.f32.mrb[10].mxu1  ;;  %6424 = vmatprep.mubr.msk.f32.mxu0 %vm435_vm1, %v4768_v62 }
 0x3a3   : > { %v6484_v35 = vadd.f32 %v6382_v30, %v6132_v8  ;;  %v4574_v26 = vpop.f32.mrb[11].mxu1  ;;  %6425 = vmatmul.mubr.msk.f32.gmra.mrb[38].mxu0 %vm435_vm1, %v4769_v49  ;;  %v4771_v40 = vmax.f32 %v4739_v63, 0.0 }
 0x3a4   : > { %v4770_v24 = vmax.f32 %v4738_v22, 0.0  ;;  %v6485_v6 = vadd.f32 %v4574_v26, %v8212_v41 }
 0x3a5   : > { %v4741_v23 = vadd.f32 %v6484_v35, %v8260_v58 }
 0x3a6   : > { %v4740_v21 = vadd.f32 %v6485_v6, %v8260_v58  ;;  %v6385_v10 = vpop.f32.mrb[12].mxu1  ;;  %6427 = vmatprep.mubr.msk.f32.mxu0 %vm435_vm1, %v4770_v24 }
 0x3a7   : > { %v6486_v4 = vadd.f32 %v6385_v10, %v8214_v47  ;;  %v4584_v20 = vpop.f32.mrb[13].mxu1  ;;  %6428 = vmatmul.mubr.msk.f32.gmra.mrb[40].mxu0 %vm435_vm1, %v4771_v40  ;;  %v4773_v29 = vmax.f32 %v4741_v23, 0.0 }
 0x3a8   : > { %v4772_v8 = vmax.f32 %v4740_v21, 0.0  ;;  %v6487_v53 = vadd.f32 %v4584_v20, %v8216_v7 }
 0x3a9   : > { %v4743_v56 = vadd.f32 %v6486_v4, %v8260_v58 }
 0x3aa   : > { %v4742_v41 = vadd.f32 %v6487_v53, %v8260_v58  ;;  %v6388_v14 = vpop.f32.mrb[14].mxu1  ;;  %6430 = vmatprep.mubr.msk.f32.mxu0 %vm435_vm1, %v4772_v8 }
 0x3ab   : > { %v6488_v34 = vadd.f32 %v6388_v14, %v8218_v28  ;;  %v4594_v43 = vpop.f32.mrb[15].mxu1  ;;  %6431 = vmatmul.mubr.msk.f32.gmra.mrb[42].mxu0 %vm435_vm1, %v4773_v29  ;;  %v4775_v39 = vmax.f32 %v4743_v56, 0.0 }
 0x3ac   : > { %v4774_v47 = vmax.f32 %v4742_v41, 0.0  ;;  %v6489_v54 = vadd.f32 %v4594_v43, %v8220_v18 }
 0x3ad   : > { %v4745_v1 = vadd.f32 %v6488_v34, %v8260_v58 }
 0x3ae   : > { %v4744_v7 = vadd.f32 %v6489_v54, %v8260_v58  ;;  %v6391_v9 = vpop.f32.mrb[16].mxu1  ;;  %6433 = vmatprep.mubr.msk.f32.mxu0 %vm435_vm1, %v4774_v47 }
 0x3af   : > { %v6490_v27 = vadd.f32 %v6391_v9, %v8222_v2  ;;  %v4604_v3 = vpop.f32.mrb[17].mxu1  ;;  %6434 = vmatmul.mubr.msk.f32.gmra.mrb[44].mxu0 %vm435_vm1, %v4775_v39  ;;  %v4777_v32 = vmax.f32 %v4745_v1, 0.0 }
 0x3b0   : > { %v4776_v28 = vmax.f32 %v4744_v7, 0.0  ;;  %v6491_v15 = vadd.f32 %v4604_v3, %v8224_v31 }
 0x3b1   : > { %v4747_v57 = vadd.f32 %v6490_v27, %v8260_v58 }
 0x3b2   : > { %v4746_v18 = vadd.f32 %v6491_v15, %v8260_v58  ;;  %v6394_v33 = vpop.f32.mrb[18].mxu1  ;;  %6436 = vmatprep.mubr.msk.f32.mxu0 %vm435_vm1, %v4776_v28 }
 0x3b3   : > { %v6492_v25 = vadd.f32 %v6394_v33, %v8226_v52  ;;  %v4614_v61 = vpop.f32.mrb[19].mxu1  ;;  %6437 = vmatmul.mubr.msk.f32.gmra.mrb[46].mxu0 %vm435_vm1, %v4777_v32  ;;  %v4779_v55 = vmax.f32 %v4747_v57, 0.0 }
 0x3b4   : > { %v4778_v2 = vmax.f32 %v4746_v18, 0.0  ;;  %v6493_v36 = vadd.f32 %v4614_v61, %v8228_v16 }
 0x3b5   : > { %v4749_v12 = vadd.f32 %v6492_v25, %v8260_v58 }
 0x3b6   : > { %v4748_v31 = vadd.f32 %v6493_v36, %v8260_v58  ;;  %v6397_v17 = vpop.f32.mrb[20].mxu1  ;;  %6439 = vmatprep.mubr.msk.f32.mxu0 %vm435_vm1, %v4778_v2 }
 0x3b7   : > { %v6494_v5 = vadd.f32 %v6397_v17, %v8230_v13  ;;  %v4624_v62 = vpop.f32.mrb[21].mxu1  ;;  %6440 = vmatmul.mubr.msk.f32.gmra.mrb[48].mxu0 %vm435_vm1, %v4779_v55  ;;  %v4781_v49 = vmax.f32 %v4749_v12, 0.0 }
 0x3b8   : > { %v4780_v52 = vmax.f32 %v4748_v31, 0.0  ;;  %v6495_v11 = vadd.f32 %v4624_v62, %v8232_v46 }
 0x3b9   : > { %v4751_v63 = vadd.f32 %v6494_v5, %v8260_v58 }
 0x3ba   : > { %v4750_v16 = vadd.f32 %v6495_v11, %v8260_v58  ;;  %v6400_v22 = vpop.f32.mrb[22].mxu1  ;;  %6442 = vmatprep.mubr.msk.f32.mxu0 %vm435_vm1, %v4780_v52 }
 0x3bb   : > { %v6496_v30 = vadd.f32 %v6400_v22, %v8234_v48  ;;  %v4634_v35 = vpop.f32.mrb[23].mxu1  ;;  %6443 = vmatmul.mubr.msk.f32.gmra.mrb[50].mxu0 %vm435_vm1, %v4781_v49  ;;  %v4783_v24 = vmax.f32 %v4751_v63, 0.0 }
 0x3bc   : > { %v4782_v13 = vmax.f32 %v4750_v16, 0.0  ;;  %v6497_v26 = vadd.f32 %v4634_v35, %v8236_v50 }
 0x3bd   : > { %v4753_v6 = vadd.f32 %v6496_v30, %v8260_v58 }
 0x3be   : > { %v4752_v46 = vadd.f32 %v6497_v26, %v8260_v58  ;;  %v6403_v40 = vpop.f32.mrb[24].mxu1  ;;  %6445 = vmatprep.mubr.msk.f32.mxu0 %vm435_vm1, %v4782_v13 }
 0x3bf   : > { %v6498_v23 = vadd.f32 %v6403_v40, %v8241_v19  ;;  %v4644_v21 = vpop.f32.mrb[25].mxu1  ;;  %6446 = vmatmul.mubr.msk.f32.gmra.mrb[52].mxu0 %vm435_vm1, %v4783_v24  ;;  %v4785_v4 = vmax.f32 %v4753_v6, 0.0 }
 0x3c0   : > { %v4784_v48 = vmax.f32 %v4752_v46, 0.0  ;;  %v6499_v10 = vadd.f32 %v4644_v21, %v8243_v59 }
 0x3c1   : > { %v4755_v20 = vadd.f32 %v6498_v23, %v8260_v58 }
 0x3c2   : > { %v4754_v50 = vadd.f32 %v6499_v10, %v8260_v58  ;;  %v6406_v8 = vpop.f32.mrb[26].mxu1  ;;  %6448 = vmatprep.mubr.msk.f32.mxu0 %vm435_vm1, %v4784_v48 }
 0x3c3   : > { %v6500_v53 = vadd.f32 %v6406_v8, %v8245_v51  ;;  %v4654_v29 = vpop.f32.mrb[27].mxu1  ;;  %6449 = vmatmul.mubr.msk.f32.gmra.mrb[54].mxu0 %vm435_vm1, %v4785_v4  ;;  %v4787_v41 = vmax.f32 %v4755_v20, 0.0 }
 0x3c4   : > { %v4786_v19 = vmax.f32 %v4754_v50, 0.0  ;;  %v6501_v56 = vadd.f32 %v4654_v29, %v8247_v42  ;;  %v5194_v29 = vpop.permute.xlu1 %5193 }
 0x3c5   : > { %v4757_v14 = vadd.f32 %v6500_v53, %v8260_v58 }
 0x3c6   : > { %v4756_v59 = vadd.f32 %v6501_v56, %v8260_v58  ;;  %v6409_v34 = vpop.f32.mrb[28].mxu1  ;;  %6451 = vmatprep.mubr.msk.f32.mxu0 %vm435_vm1, %v4786_v19  ;;  %v5189_v19 = vpop.permute.xlu0 %5188 }
 0x3c7   : > { %v6502_v43 = vadd.f32 %v6409_v34, %v8249_v60  ;;  %v4664_v47 = vpop.f32.mrb[29].mxu1  ;;  %6452 = vmatmul.mubr.msk.f32.gmra.mrb[56].mxu0 %vm435_vm1, %v4787_v41  ;;  %v4789_v39 = vmax.f32 %v4757_v14, 0.0  ;;  %v6744_v14 = vld [vmem:[%s6823_s8] sm:$0xff] }
 0x3c8   : > { %v4788_v51 = vmax.f32 %v4756_v59, 0.0  ;;  %v6503_v54 = vadd.f32 %v4664_v47, %v8251_v0 }
 0x3c9   : > { %v4759_v1 = vadd.f32 %v6502_v43, %v8260_v58 }
 0x3ca   : > { %v4758_v42 = vadd.f32 %v6503_v54, %v8260_v58  ;;  %v6412_v7 = vpop.f32.mrb[30].mxu1  ;;  %6454 = vmatprep.mubr.msk.f32.mxu0 %vm435_vm1, %v4788_v51  ;;  %v5199_v51 = vpop.permute.xlu0 %5198  ;;  %v6745_v54 = vld [vmem:[%s6823_s8 + $0x10] sm:$0xff] }
 0x3cb   : > { %v6504_v9 = vadd.f32 %v6412_v7, %v8253_v38  ;;  %v4674_v27 = vpop.f32.mrb[31].mxu1  ;;  %6455 = vmatmul.mubr.msk.f32.gmra.mrb[58].mxu0 %vm435_vm1, %v4789_v39  ;;  %v4791_v28 = vmax.f32 %v4759_v1, 0.0 }
 0x3cc   : > { %v4790_v60 = vmax.f32 %v4758_v42, 0.0  ;;  %v6505_v3 = vadd.f32 %v4674_v27, %v8255_v37 }
 0x3cd   : > { %v4761_v15 = vadd.f32 %v6504_v9, %v8260_v58  ;;  %v6746_v9 = vld [vmem:[%s6823_s8 + $0x20] sm:$0xff] }
 0x3ce   : > { %v4760_v0 = vadd.f32 %v6505_v3, %v8260_v58  ;;  %v6415_v32 = vpop.f32.mrb[0].mxu1  ;;  %6457 = vmatprep.mubr.msk.f32.mxu0 %vm435_vm1, %v4790_v60  ;;  %v5204_v60 = vpop.permute.xlu0 %5203 }
 0x3cf   : > { %v6506_v57 = vadd.f32 %v6415_v32, %v8208_v45  ;;  %v4684_v18 = vpop.f32.mrb[1].mxu1  ;;  %6458 = vmatmul.mubr.msk.f32.gmra.mrb[60].mxu0 %vm435_vm1, %v4791_v28  ;;  %v4793_v25 = vmax.f32 %v4761_v15, 0.0 }
 0x3d0   : > { %v4792_v38 = vmax.f32 %v4760_v0, 0.0  ;;  %v6507_v33 = vadd.f32 %v4684_v18, %v8210_v44  ;;  %v6747_v0 = vld [vmem:[%s6823_s8 + $0x30] sm:$0xff] }
 0x3d1   : > { %v4763_v61 = vadd.f32 %v6506_v57, %v8260_v58 }
 0x3d2   : > { %v4762_v37 = vadd.f32 %v6507_v33, %v8260_v58  ;;  %6460 = vmatprep.mubr.msk.f32.mxu0 %vm435_vm1, %v4792_v38  ;;  %v6748_v33 = vld [vmem:[%s6823_s8 + $0x8] sm:$0xff] }
 0x3d3   : > { %6461 = vmatmul.mubr.msk.f32.gmra.mrb[62].mxu0 %vm435_vm1, %v4793_v25  ;;  %v4795_v36 = vmax.f32 %v4763_v61, 0.0 }
 0x3d4   : > { %v4794_v2 = vmax.f32 %v4762_v37, 0.0 }
 0x3d6   : > { %6463 = vmatprep.mubr.msk.f32.mxu0 %vm435_vm1, %v4794_v2 }
 0x3d7   : > { %6464 = vmatmul.mubr.msk.f32.gmra.mrb[64].mxu0 %vm435_vm1, %v4795_v36  ;;  %v6749_v36 = vld [vmem:[%s6823_s8 + $0x18] sm:$0xff] }
 0x46e   : > { %v6420_v45 = vpop.f32.mrb[34].mxu0 }
 0x46f   : > { %v4959_v55 = vpop.f32.mrb[35].mxu0 }
 0x470   : > { %5118 = vxpose.xlu1.b32.start [1/16] (narrow) %v4959_v55, 32 }
 0x472   : > { %v6423_v12 = vpop.f32.mrb[36].mxu0 }
 0x473   : > { %v4969_v44 = vpop.f32.mrb[37].mxu0 }
 0x474   : > { %5119 = vxpose.xlu1.b32.cont [2/16] (narrow) %v6420_v45, 32 }
 0x476   : > { %v6426_v31 = vpop.f32.mrb[38].mxu0 }
 0x477   : > { %v4979_v17 = vpop.f32.mrb[39].mxu0 }
 0x478   : > { %5120 = vxpose.xlu1.b32.cont [3/16] (narrow) %v4969_v44, 32 }
 0x47a   : > { %v6429_v58 = vpop.f32.mrb[40].mxu0 }
 0x47b   : > { %v4989_v5 = vpop.f32.mrb[41].mxu0 }
 0x47c   : > { %5121 = vxpose.xlu1.b32.cont [4/16] (narrow) %v6423_v12, 32 }
 0x47e   : > { %v6432_v62 = vpop.f32.mrb[42].mxu0 }
 0x47f   : > { %v4999_v52 = vpop.f32.mrb[43].mxu0 }
 0x480   : > { %5122 = vxpose.xlu1.b32.cont [5/16] (narrow) %v4979_v17, 32 }
 0x482   : > { %v6435_v11 = vpop.f32.mrb[44].mxu0 }
 0x483   : > { %v5009_v49 = vpop.f32.mrb[45].mxu0 }
 0x484   : > { %5123 = vxpose.xlu1.b32.cont [6/16] (narrow) %v6426_v31, 32  ;;  %v6750_v31 = vld [vmem:[%s6823_s8 + $0x28] sm:$0xff] }
 0x486   : > { %v6438_v63 = vpop.f32.mrb[46].mxu0 }
 0x487   : > { %v5019_v16 = vpop.f32.mrb[47].mxu0 }
 0x488   : > { %5124 = vxpose.xlu1.b32.cont [7/16] (narrow) %v4989_v5, 32 }
 0x48a   : > { %v6441_v22 = vpop.f32.mrb[48].mxu0 }
 0x48b   : > { %v5029_v30 = vpop.f32.mrb[49].mxu0 }
 0x48c   : > { %5125 = vxpose.xlu1.b32.cont [8/16] (narrow) %v6429_v58, 32 }
 0x48e   : > { %v6444_v35 = vpop.f32.mrb[50].mxu0 }
 0x48f   : > { %v5039_v13 = vpop.f32.mrb[51].mxu0 }
 0x490   : > { %5126 = vxpose.xlu1.b32.cont [9/16] (narrow) %v4999_v52, 32  ;;  %5150 = vxpose.xlu0.b32.start [1/16] (narrow) %v5039_v13, 32  ;;  %v6751_v52 = vld [vmem:[%s6823_s8 + $0x38] sm:$0xff] }
 0x492   : > { %v6447_v26 = vpop.f32.mrb[52].mxu0 }
 0x493   : > { %v5049_v24 = vpop.f32.mrb[53].mxu0 }
 0x494   : > { %5127 = vxpose.xlu1.b32.cont [10/16] (narrow) %v6432_v62, 32  ;;  %5151 = vxpose.xlu0.b32.cont [2/16] (narrow) %v6444_v35, 32 }
 0x496   : > { %v6450_v6 = vpop.f32.mrb[54].mxu0 }
 0x497   : > { %v5059_v46 = vpop.f32.mrb[55].mxu0 }
 0x498   : > { %5128 = vxpose.xlu1.b32.cont [11/16] (narrow) %v5009_v49, 32  ;;  %5152 = vxpose.xlu0.b32.cont [3/16] (narrow) %v5049_v24, 32 }
 0x49a   : > { %v6453_v40 = vpop.f32.mrb[56].mxu0 }
 0x49b   : > { %v5069_v23 = vpop.f32.mrb[57].mxu0 }
 0x49c   : > { %5129 = vxpose.xlu1.b32.cont [12/16] (narrow) %v6435_v11, 32  ;;  %5153 = vxpose.xlu0.b32.cont [4/16] (narrow) %v6447_v26, 32 }
 0x49e   : > { %v6456_v21 = vpop.f32.mrb[58].mxu0 }
 0x49f   : > { %v5079_v48 = vpop.f32.mrb[59].mxu0 }
 0x4a0   : > { %5130 = vxpose.xlu1.b32.cont [13/16] (narrow) %v5019_v16, 32  ;;  %5154 = vxpose.xlu0.b32.cont [5/16] (narrow) %v5059_v46, 32 }
 0x4a2   : > { %v6459_v10 = vpop.f32.mrb[60].mxu0 }
 0x4a3   : > { %v5089_v4 = vpop.f32.mrb[61].mxu0 }
 0x4a4   : > { %5131 = vxpose.xlu1.b32.cont [14/16] (narrow) %v6438_v63, 32  ;;  %5155 = vxpose.xlu0.b32.cont [6/16] (narrow) %v6450_v6, 32 }
 0x4a6   : > { %v6462_v20 = vpop.f32.mrb[62].mxu0 }
 0x4a7   : > { %v5099_v50 = vpop.f32.mrb[63].mxu0 }
 0x4a8   : > { %5132 = vxpose.xlu1.b32.cont [15/16] (narrow) %v5029_v30, 32  ;;  %5156 = vxpose.xlu0.b32.cont [7/16] (narrow) %v5069_v23, 32 }
 0x4aa   : > { %v6465_v8 = vpop.f32.mrb[64].mxu0 }
 0x4ab   : > { %v5109_v53 = vpop.f32.mrb[65].mxu0 }
 0x4ac   : > { %5133 = vxpose.xlu1.b32.end [16/16] (narrow) %v6441_v22, 32  ;;  %5157 = vxpose.xlu0.b32.cont [8/16] (narrow) %v6453_v40, 32 }
 0x4b0   : > { %5158 = vxpose.xlu0.b32.cont [9/16] (narrow) %v5079_v48, 32 }
 0x4b4   : > { %5159 = vxpose.xlu0.b32.cont [10/16] (narrow) %v6456_v21, 32 }
 0x4b8   : > { %5160 = vxpose.xlu0.b32.cont [11/16] (narrow) %v5089_v4, 32 }
 0x4bc   : > { %5161 = vxpose.xlu0.b32.cont [12/16] (narrow) %v6459_v10, 32 }
 0x4c0   : > { %5162 = vxpose.xlu0.b32.cont [13/16] (narrow) %v5099_v50, 32 }
 0x4c4   : > { %5163 = vxpose.xlu0.b32.cont [14/16] (narrow) %v6462_v20, 32 }
 0x4c8   : > { %5164 = vxpose.xlu0.b32.cont [15/16] (narrow) %v5109_v53, 32 }
 0x4cc   : > { %5165 = vxpose.xlu0.b32.end [16/16] (narrow) %v6465_v8, 32 }
 0x4f0   : > { %v5134_v56 = vpop.trf.xlu1 }
 0x4f1   : > { %v5206_v41 = vadd.f32 %v5189_v19, %v5134_v56 }
 0x4f3   : > { %v5214_v59 = vadd.f32 %v6744_v14, %v5206_v41 }
 0x4f4   : > { %v5135_v34 = vpop.trf.xlu1 }
 0x4f5   : > { %v5222_v43 = vmax.f32 %v5214_v59, 0.0  ;;  %v5208_v47 = vadd.f32 %v5194_v29, %v5135_v34 }
 0x4f7   : > { %5230 = vst [vmem:[%s8355_s26] sm:$0xff] %v5222_v43  ;;  %v5216_v39 = vadd.f32 %v6745_v54, %v5208_v47 }
 0x4f8   : > { %v5136_v1 = vpop.trf.xlu1 }
 0x4f9   : > { %v5224_v42 = vmax.f32 %v5216_v39, 0.0  ;;  %v5210_v7 = vadd.f32 %v5199_v51, %v5136_v1 }
 0x4fb   : > { %5232 = vst [vmem:[%s8355_s26 + $0x10] sm:$0xff] %v5224_v42  ;;  %v5218_v27 = vadd.f32 %v6746_v9, %v5210_v7 }
 0x4fc   : > { %v5137_v3 = vpop.trf.xlu1 }
 0x4fd   : > { %v5226_v28 = vmax.f32 %v5218_v27, 0.0  ;;  %v5212_v15 = vadd.f32 %v5204_v60, %v5137_v3 }
 0x4ff   : > { %5234 = vst [vmem:[%s8355_s26 + $0x20] sm:$0xff] %v5226_v28  ;;  %v5220_v32 = vadd.f32 %v6747_v0, %v5212_v15 }
 0x501   : > { %v5228_v57 = vmax.f32 %v5220_v32, 0.0 }
 0x503   : > { %5236 = vst [vmem:[%s8355_s26 + $0x30] sm:$0xff] %v5228_v57 }
 0x510   : > { %v5166_v18 = vpop.trf.xlu0 }
 0x511   : > { %v5207_v38 = vadd.f32 %v5189_v19, %v5166_v18 }
 0x513   : > { %v5215_v25 = vadd.f32 %v6748_v33, %v5207_v38 }
 0x514   : > { %v5167_v61 = vpop.trf.xlu0 }
 0x515   : > { %v5223_v37 = vmax.f32 %v5215_v25, 0.0  ;;  %v5209_v2 = vadd.f32 %v5194_v29, %v5167_v61 }
 0x517   : > { %5231 = vst [vmem:[%s8355_s26 + $0x8] sm:$0xff] %v5223_v37  ;;  %v5217_v45 = vadd.f32 %v6749_v36, %v5209_v2 }
 0x518   : > { %v5168_v55 = vpop.trf.xlu0 }
 0x519   : > { %v5225_v12 = vmax.f32 %v5217_v45, 0.0  ;;  %v5211_v44 = vadd.f32 %v5199_v51, %v5168_v55 }
 0x51b   : > { %5233 = vst [vmem:[%s8355_s26 + $0x18] sm:$0xff] %v5225_v12  ;;  %v5219_v17 = vadd.f32 %v6750_v31, %v5211_v44 }
 0x51c   : > { %v5169_v58 = vpop.trf.xlu0 }
 0x51d   : > { %v5227_v5 = vmax.f32 %v5219_v17, 0.0  ;;  %v5213_v62 = vadd.f32 %v5204_v60, %v5169_v58 }
 0x51f   : > { %5235 = vst [vmem:[%s8355_s26 + $0x28] sm:$0xff] %v5227_v5  ;;  %v5221_v11 = vadd.f32 %v6751_v52, %v5213_v62 }
 0x521   : > { %v5229_v49 = vmax.f32 %v5221_v11, 0.0 }
 0x523   : > { %5237 = vst [vmem:[%s8355_s26 + $0x38] sm:$0xff] %v5229_v49 }
 0x524 PF: > { %s17_s24 = sadd.s32 1, %s6758_s24  }
 0x525   : > { %p14_p4 = scmp.ge.s32.totalorder %s17_s24, 4  }
 0x527   :  { %16 = sbr.rel (!%p14_p4) target bundleno = 1 (0x1), region = 86 }

</bundles_post_ra>
